<compile_context>
chip_gen: v5e
topology: v5e:2x2
jax: 0.10.0
libtpu: 0.0.40
codegen_flags: <defaults>
</compile_context>

<pallas_src>
import functools

import jax
import jax.numpy as jnp
import numpy as np
from jax import lax
from jax.experimental import pallas as pl
from jax.experimental.pallas import tpu as pltpu

EPS = 1e-5
NEG_SLOPE = 0.2
MATMUL_DTYPE = jnp.bfloat16          # MXU operand dtype (accumulation stays f32)
_VMEM_LIMIT = 48 * 1024 * 1024       # raise scoped-VMEM ceiling; safe on v5e/v6e/v7x


def _round_up(a, b):
    return (a + b - 1) // b * b


# ---------------------------------------------------------------------------
# Kernels
# ---------------------------------------------------------------------------
def _conv_stats_halo_kernel(xc_ref, xl_ref, xr_ref, w_ref, m_ref, y_ref, st_ref,
                            *, tap_offsets, tp, hb):
    """k x k conv as a single MXU matmul over shifted lane-slices + masked BN-stat accum."""
    @pl.when(pl.program_id(0) == 0)
    def _init():
        st_ref[...] = jnp.zeros_like(st_ref)

    # (Cin, hb + tp + hb): left halo | centre tile | right halo
    ext = jnp.concatenate([xl_ref[...], xc_ref[...], xr_ref[...]],
                          axis=1).astype(MATMUL_DTYPE)
    # Static shifted slices -> (k*k*Cin, tp) "virtual im2col" (never touches HBM).
    patches = jnp.concatenate(
        [ext[:, hb + o: hb + o + tp] for o in tap_offsets], axis=0)
    acc = jnp.dot(w_ref[...], patches,
                  preferred_element_type=jnp.float32)            # (Cout, tp), lane dense
    y_ref[...] = acc
    am = acc * m_ref[...]                                        # mask pad / tail pixels
    st_ref[...] += jnp.concatenate(
        [jnp.sum(am, axis=1, keepdims=True),
         jnp.sum(am * acc, axis=1, keepdims=True)], axis=1)      # (Cout, 2): sum, sumsq


def _conv_stats_1x1_kernel(xc_ref, w_ref, m_ref, y_ref, st_ref):
    """1x1 conv (down_sample path) + masked BN-stat accumulation."""
    @pl.when(pl.program_id(0) == 0)
    def _init():
        st_ref[...] = jnp.zeros_like(st_ref)
    acc = jnp.dot(w_ref[...], xc_ref[...].astype(MATMUL_DTYPE),
                  preferred_element_type=jnp.float32)
    y_ref[...] = acc
    am = acc * m_ref[...]
    st_ref[...] += jnp.concatenate(
        [jnp.sum(am, axis=1, keepdims=True),
         jnp.sum(am * acc, axis=1, keepdims=True)], axis=1)


def _bn_apply_kernel(y_ref, st_ref, g_ref, b_ref, m_ref, o_ref, *, inv_count):
    """BatchNorm (batch stats) + LeakyReLU(0.2); re-zeroes pad-ring / tail pixels."""
    st = st_ref[...]
    mean = st[:, 0:1] * inv_count
    var = jnp.maximum(st[:, 1:2] * inv_count - mean * mean, 0.0)
    z = (y_ref[...] - mean) * (lax.rsqrt(var + EPS) * g_ref[...]) + b_ref[...]
    z = jnp.where(z >= 0.0, z, NEG_SLOPE * z)
    o_ref[...] = z * m_ref[...]


def _residual_stats_kernel(y_ref, sty_ref, gy_ref, by_ref,
                           d_ref, std_ref, gd_ref, bd_ref,
                           m_ref, s_ref, st_ref, *, inv_count):
    """Fused: last-stage BN+LReLU, down_sample BN, residual add, final-BN stat accum."""
    @pl.when(pl.program_id(0) == 0)
    def _init():
        st_ref[...] = jnp.zeros_like(st_ref)

    sty = sty_ref[...]
    mean_y = sty[:, 0:1] * inv_count
    var_y = jnp.maximum(sty[:, 1:2] * inv_count - mean_y * mean_y, 0.0)
    cy = (y_ref[...] - mean_y) * (lax.rsqrt(var_y + EPS) * gy_ref[...]) + by_ref[...]
    cy = jnp.where(cy >= 0.0, cy, NEG_SLOPE * cy)                 # conv-chain output

    std = std_ref[...]
    mean_d = std[:, 0:1] * inv_count
    var_d = jnp.maximum(std[:, 1:2] * inv_count - mean_d * mean_d, 0.0)
    dn = (d_ref[...] - mean_d) * (lax.rsqrt(var_d + EPS) * gd_ref[...]) + bd_ref[...]

    s = cy + dn                                                   # out += identity
    s_ref[...] = s
    sm = s * m_ref[...]
    st_ref[...] += jnp.concatenate(
        [jnp.sum(sm, axis=1, keepdims=True),
         jnp.sum(sm * s, axis=1, keepdims=True)], axis=1)


# ---------------------------------------------------------------------------
# pallas_call builders
# ---------------------------------------------------------------------------
def _conv_stats_call(x, w_mat, mask, tap_offsets, tp, hb):
    cin, lout = x.shape
    cout, kdim = w_mat.shape
    n_tiles = lout // tp
    g = tp // hb
    nblk = lout // hb
    use_halo = not (len(tap_offsets) == 1 and tap_offsets[0] == 0)

    out_shape = (jax.ShapeDtypeStruct((cout, lout), jnp.float32),
                 jax.ShapeDtypeStruct((cout, 2), jnp.float32))
    out_specs = (pl.BlockSpec((cout, tp), lambda t: (0, t)),
                 pl.BlockSpec((cout, 2), lambda t: (0, 0)))       # resident accumulator
    cp = pltpu.CompilerParams(dimension_semantics=("arbitrary",),
                              vmem_limit_bytes=_VMEM_LIMIT)

    if use_halo:
        kernel = functools.partial(_conv_stats_halo_kernel,
                                   tap_offsets=tuple(tap_offsets), tp=tp, hb=hb)
        in_specs = [
            pl.BlockSpec((cin, tp), lambda t: (0, t)),                                 # centre
            pl.BlockSpec((cin, hb), lambda t: (0, jnp.maximum(t * g - 1, 0))),         # left halo
            pl.BlockSpec((cin, hb), lambda t: (0, jnp.minimum(t * g + g, nblk - 1))),  # right halo
            pl.BlockSpec((cout, kdim), lambda t: (0, 0)),                              # weights
            pl.BlockSpec((1, tp), lambda t: (0, t)),                                   # valid mask
        ]
        args = (x, x, x, w_mat, mask)
    else:
        kernel = _conv_stats_1x1_kernel
        in_specs = [
            pl.BlockSpec((cin, tp), lambda t: (0, t)),
            pl.BlockSpec((cout, kdim), lambda t: (0, 0)),
            pl.BlockSpec((1, tp), lambda t: (0, t)),
        ]
        args = (x, w_mat, mask)

    return pl.pallas_call(kernel, out_shape=out_shape, grid=(n_tiles,),
                          in_specs=in_specs, out_specs=out_specs,
                          compiler_params=cp)(*args)


def _bn_apply_call(y, stats, gamma, beta, mask, count, tp):
    cout, lout = y.shape
    n_tiles = lout // tp
    kernel = functools.partial(_bn_apply_kernel, inv_count=1.0 / count)
    return pl.pallas_call(
        kernel,
        out_shape=jax.ShapeDtypeStruct((cout, lout), jnp.float32),
        grid=(n_tiles,),
        in_specs=[
            pl.BlockSpec((cout, tp), lambda t: (0, t)),
            pl.BlockSpec((cout, 2), lambda t: (0, 0)),
            pl.BlockSpec((cout, 1), lambda t: (0, 0)),
            pl.BlockSpec((cout, 1), lambda t: (0, 0)),
            pl.BlockSpec((1, tp), lambda t: (0, t)),
        ],
        out_specs=pl.BlockSpec((cout, tp), lambda t: (0, t)),
        compiler_params=pltpu.CompilerParams(dimension_semantics=("parallel",),
                                             vmem_limit_bytes=_VMEM_LIMIT),
    )(y, stats, gamma.reshape(cout, 1).astype(jnp.float32),
      beta.reshape(cout, 1).astype(jnp.float32), mask)


def _residual_stats_call(y, st_y, g_y, b_y, ds, st_d, g_d, b_d, mask, count, tp):
    cout, lout = y.shape
    n_tiles = lout // tp
    kernel = functools.partial(_residual_stats_kernel, inv_count=1.0 / count)
    vec = lambda a: a.reshape(cout, 1).astype(jnp.float32)
    return pl.pallas_call(
        kernel,
        out_shape=(jax.ShapeDtypeStruct((cout, lout), jnp.float32),
                   jax.ShapeDtypeStruct((cout, 2), jnp.float32)),
        grid=(n_tiles,),
        in_specs=[
            pl.BlockSpec((cout, tp), lambda t: (0, t)),   # y (pre-BN, last conv stage)
            pl.BlockSpec((cout, 2), lambda t: (0, 0)),    # its stats
            pl.BlockSpec((cout, 1), lambda t: (0, 0)),    # gamma (last stage BN)
            pl.BlockSpec((cout, 1), lambda t: (0, 0)),    # beta
            pl.BlockSpec((cout, tp), lambda t: (0, t)),   # ds (pre-BN 1x1 conv)
            pl.BlockSpec((cout, 2), lambda t: (0, 0)),    # its stats
            pl.BlockSpec((cout, 1), lambda t: (0, 0)),    # gamma (down_sample BN)
            pl.BlockSpec((cout, 1), lambda t: (0, 0)),    # beta
            pl.BlockSpec((1, tp), lambda t: (0, t)),      # valid mask
        ],
        out_specs=(pl.BlockSpec((cout, tp), lambda t: (0, t)),
                   pl.BlockSpec((cout, 2), lambda t: (0, 0))),
        compiler_params=pltpu.CompilerParams(dimension_semantics=("arbitrary",),
                                             vmem_limit_bytes=_VMEM_LIMIT),
    )(y, st_y, vec(g_y), vec(b_y), ds, st_d, vec(g_d), vec(b_d), mask)


# ---------------------------------------------------------------------------
# Wrapper: layout plumbing + kernel orchestration
# ---------------------------------------------------------------------------
@functools.partial(jax.jit, static_argnames=("kernel_size_list",))
def up_res_layer_pallas(x_nchw, params, kernel_size_list):
    n, cin0, h0, w0 = x_nchw.shape
    x32 = x_nchw.astype(jnp.float32)

    # nn.Upsample(scale_factor=2, mode='nearest')
    # TODO(synk): fold the nearest-x2 upsample into the first conv's tap/index math so
    #             `up` is never materialized in HBM.
    up = jnp.repeat(jnp.repeat(x32, 2, axis=2), 2, axis=3)
    h, w = 2 * h0, 2 * w0

    pad = max((k - 1) // 2 for k in kernel_size_list)     # shared zero ring width
    hp, wp = h + 2 * pad, w + 2 * pad
    total = n * hp * wp
    max_off = pad * wp + pad                              # largest conv tap offset (flat)
    hb = _round_up(max(max_off, 1), 128)                  # halo block (lane multiple)
    tp = hb * max(1, 512 // hb)                           # lane-dense pixel tile (sweepable)
    lout = _round_up(total, tp)
    count = float(n * h * w)                              # valid pixels for BN batch stats
    assert tp % hb == 0 and lout % tp == 0

    def to_flat(a):   # (n, c, h, w) -> channel-major padded-flat (c, lout)
        ap = jnp.pad(a, ((0, 0), (0, 0), (pad, pad), (pad, pad)))
        af = jnp.transpose(ap, (1, 0, 2, 3)).reshape(a.shape[1], total)
        return jnp.pad(af, ((0, 0), (0, lout - total)))

    up_flat = to_flat(up)                                           # (cin0, lout)
    mask = to_flat(jnp.ones((n, 1, h, w), jnp.float32))             # (1, lout)

    # ---- conv chain ----
    xcur, ccur = up_flat, cin0
    y_last = st_last = g_last = b_last = None
    n_stages = len(kernel_size_list)
    for i, k in enumerate(kernel_size_list):
        wk, _bk, gk, bek = params["conv"][i]      # conv bias dropped (cancelled by BN)
        cout = wk.shape[0]
        pk = (k - 1) // 2
        offs = [(dy - pk) * wp + (dx - pk) for dy in range(k) for dx in range(k)]
        w_mat = jnp.transpose(wk, (0, 2, 3, 1)).reshape(cout, k * k * ccur)
        w_mat = w_mat.astype(MATMUL_DTYPE)
        y, st = _conv_stats_call(xcur, w_mat, mask, offs, tp, hb)
        if i < n_stages - 1:
            xcur = _bn_apply_call(y, st, gk, bek, mask, count, tp)
            ccur = cout
        else:
            y_last, st_last, g_last, b_last = y, st, gk, bek
            ccur = cout

    # ---- identity path (1x1 conv + BN), residual add, final BN + LeakyReLU ----
    wds, _bds, gds, beds = params["down"]         # bias dropped (cancelled by BN)
    cout = wds.shape[0]
    wds_mat = wds.reshape(cout, cin0).astype(MATMUL_DTYPE)
    ds, st_ds = _conv_stats_call(up_flat, wds_mat, mask, [0], tp, hb)

    s, st_s = _residual_stats_call(y_last, st_last, g_last, b_last,
                                   ds, st_ds, gds, beds, mask, count, tp)
    gf, bef = params["final_bn"]
    out_flat = _bn_apply_call(s, st_s, gf, bef, mask, count, tp)

    out = out_flat[:, :total].reshape(cout, n, hp, wp)[:, :, pad:pad + h, pad:pad + w]
    return jnp.transpose(out, (1, 0, 2, 3))       # back to NCHW


# ---------------------------------------------------------------------------
# Pure-JAX f32 reference (mirrors the PyTorch module, incl. conv biases)
# ---------------------------------------------------------------------------
def _lrelu(x):
    return jnp.where(x >= 0, x, NEG_SLOPE * x)


def _bn_train(x, g, b):     # NCHW, training-mode batch stats, biased variance
    m = jnp.mean(x, axis=(0, 2, 3), keepdims=True)
    v = jnp.mean((x - m) ** 2, axis=(0, 2, 3), keepdims=True)
    return (x - m) * lax.rsqrt(v + EPS) * g.reshape(1, -1, 1, 1) + b.reshape(1, -1, 1, 1)


def _conv_nchw(x, w, b, padding):
    y = lax.conv_general_dilated(x, w, (1, 1), ((padding, padding), (padding, padding)),
                                 dimension_numbers=("NCHW", "OIHW", "NCHW"))
    return y + b.reshape(1, -1, 1, 1)


def up_res_layer_ref(x_nchw, params, kernel_size_list):
    x = x_nchw.astype(jnp.float32)
    up = jnp.repeat(jnp.repeat(x, 2, axis=2), 2, axis=3)
    h = up
    for i, k in enumerate(kernel_size_list):
        wk, bk, gk, bek = params["conv"][i]
        h = _lrelu(_bn_train(_conv_nchw(h, wk, bk, (k - 1) // 2), gk, bek))
    wds, bds, gds, beds = params["down"]
    ident = _bn_train(_conv_nchw(up, wds, bds, 0), gds, beds)
    gf, bef = params["final_bn"]
    return _lrelu(_bn_train(h + ident, gf, bef))


# ---------------------------------------------------------------------------
def make_params(key, in_channel, out_channel, kernel_size_list):
    params = {"conv": []}
    cin = in_channel
    for k in kernel_size_list:
        key, k1, k2, k3, k4 = jax.random.split(key, 5)
        wk = jax.random.normal(k1, (out_channel, cin, k, k), jnp.float32) * 0.1   # OIHW
        bk = jax.random.normal(k2, (out_channel,), jnp.float32) * 0.05
        gk = 1.0 + 0.1 * jax.random.normal(k3, (out_channel,), jnp.float32)
        bek = 0.05 * jax.random.normal(k4, (out_channel,), jnp.float32)
        params["conv"].append((wk, bk, gk, bek))
        cin = out_channel
    key, k1, k2, k3, k4, k5, k6 = jax.random.split(key, 7)
    params["down"] = (
        jax.random.normal(k1, (out_channel, in_channel, 1, 1), jnp.float32) * 0.1,
        jax.random.normal(k2, (out_channel,), jnp.float32) * 0.05,
        1.0 + 0.1 * jax.random.normal(k3, (out_channel,), jnp.float32),
        0.05 * jax.random.normal(k4, (out_channel,), jnp.float32),
    )
    params["final_bn"] = (
        1.0 + 0.1 * jax.random.normal(k5, (out_channel,), jnp.float32),
        0.05 * jax.random.normal(k6, (out_channel,), jnp.float32),
    )
    return params


if __name__ == "__main__":
    in_channel, out_channel = 4, 8
    kernel_size_list = (3, 3)
    N, H, W = 2, 8, 8

    key = jax.random.PRNGKey(0)
    kx, kp = jax.random.split(key)
    x = jax.random.normal(kx, (N, in_channel, H, W), jnp.float32)   # NCHW, like PyTorch
    params = make_params(kp, in_channel, out_channel, kernel_size_list)

    out = up_res_layer_pallas(x, params, kernel_size_list)
    out = jax.block_until_ready(out)
    assert out.shape == (N, out_channel, 2 * H, 2 * W), out.shape

    ref = jax.block_until_ready(up_res_layer_ref(x, params, kernel_size_list))
    # bf16 MXU operands (per perf guidance) vs a pure-f32 reference -> relaxed tolerance.
    np.testing.assert_allclose(np.asarray(out), np.asarray(ref), rtol=3e-2, atol=3e-2)

    print("KERNEL_OK")
</pallas_src>

<mosaic_0001>
module attributes {stable_mosaic.version = 11 : i64} {
  func.func @_conv_stats_1x1_kernel(%arg0: i32, %arg1: memref<4x512xf32, #tpu.memory_space<vmem>>, %arg2: memref<8x4xbf16, #tpu.memory_space<vmem>>, %arg3: memref<1x512xf32, #tpu.memory_space<vmem>>, %arg4: memref<8x512xf32, #tpu.memory_space<vmem>>, %arg5: memref<8x2xf32, #tpu.memory_space<vmem>>) attributes {dimension_semantics = [#tpu.dimension_semantics<arbitrary>], iteration_bounds = array<i64: 2>, scalar_prefetch = 0 : i64, scratch_operands = 0 : i64, tpu.core_type = #tpu.core_type<tc>, window_params = [{transform_indices = @transform_0, window_bounds = array<i64: 4, 512>}, {pipeline_mode = #tpu.pipeline_mode<synchronous>, transform_indices = @transform_1, window_bounds = array<i64: 8, 4>}, {transform_indices = @transform_2, window_bounds = array<i64: 1, 512>}, {transform_indices = @transform_3, window_bounds = array<i64: 8, 512>}, {pipeline_mode = #tpu.pipeline_mode<synchronous>, transform_indices = @transform_4, window_bounds = array<i64: 8, 2>}]} {
    %c0_i32 = arith.constant 0 : i32
    %0 = arith.cmpi eq, %arg0, %c0_i32 : i32
    %1 = arith.extui %0 : i1 to i32
    %c0_i32_0 = arith.constant 0 : i32
    %2 = arith.cmpi ne, %1, %c0_i32_0 : i32
    scf.if %2 {
      %cst_14 = arith.constant 0.000000e+00 : f32
      %20 = vector.broadcast %cst_14 : f32 to vector<8x2xf32>
      %c0_15 = arith.constant 0 : index
      %c0_16 = arith.constant 0 : index
      %21 = vector.load %arg5[%c0_15, %c0_16] : memref<8x2xf32, #tpu.memory_space<vmem>>, vector<8x2xf32>
      tpu.vector_store %arg5[%c0_15, %c0_16], %20 {strides = array<i32>} : memref<8x2xf32, #tpu.memory_space<vmem>>, vector<8x2xf32>,
    } else {
    }
    %c0 = arith.constant 0 : index
    %c0_1 = arith.constant 0 : index
    %3 = vector.load %arg2[%c0, %c0_1] : memref<8x4xbf16, #tpu.memory_space<vmem>>, vector<8x4xbf16>
    %c0_2 = arith.constant 0 : index
    %c0_3 = arith.constant 0 : index
    %4 = vector.load %arg1[%c0_2, %c0_3] : memref<4x512xf32, #tpu.memory_space<vmem>>, vector<4x512xf32>
    %5 = arith.truncf %4 : vector<4x512xf32> to vector<4x512xbf16>
    %cst = arith.constant dense<0.000000e+00> : vector<8x512xf32>
    %6 = tpu.matmul %3, %5, %cst {dimension_numbers = #tpu.dot_dimension_numbers<[1], [0], [0], [1], [0, 0, 1, 1], [], []>} : vector<8x4xbf16>, vector<4x512xbf16>, vector<8x512xf32> -> vector<8x512xf32>
    %c0_4 = arith.constant 0 : index
    %c0_5 = arith.constant 0 : index
    %7 = vector.load %arg4[%c0_4, %c0_5] : memref<8x512xf32, #tpu.memory_space<vmem>>, vector<8x512xf32>
    tpu.vector_store %arg4[%c0_4, %c0_5], %6 {strides = array<i32>} : memref<8x512xf32, #tpu.memory_space<vmem>>, vector<8x512xf32>,
    %c0_6 = arith.constant 0 : index
    %c0_7 = arith.constant 0 : index
    %8 = vector.load %arg3[%c0_6, %c0_7] : memref<1x512xf32, #tpu.memory_space<vmem>>, vector<1x512xf32>
    %9 = vector.broadcast %8 : vector<1x512xf32> to vector<8x512xf32>
    %10 = arith.mulf %6, %9 : vector<8x512xf32>
    %c0_8 = arith.constant 0 : index
    %c0_9 = arith.constant 0 : index
    %11 = vector.load %arg5[%c0_8, %c0_9] : memref<8x2xf32, #tpu.memory_space<vmem>>, vector<8x2xf32>
    %cst_10 = arith.constant dense<0.000000e+00> : vector<8xf32>
    %12 = vector.multi_reduction <add>, %10, %cst_10 [1] : vector<8x512xf32> to vector<8xf32>
    %13 = vector.shape_cast %12 : vector<8xf32> to vector<8x1xf32>
    %14 = arith.mulf %10, %6 : vector<8x512xf32>
    %cst_11 = arith.constant dense<0.000000e+00> : vector<8xf32>
    %15 = vector.multi_reduction <add>, %14, %cst_11 [1] : vector<8x512xf32> to vector<8xf32>
    %16 = vector.shape_cast %15 : vector<8xf32> to vector<8x1xf32>
    %17 = tpu.concatenate %13, %16 in 1 : vector<8x1xf32>, vector<8x1xf32> -> vector<8x2xf32>
    %18 = arith.addf %11, %17 : vector<8x2xf32>
    %c0_12 = arith.constant 0 : index
    %c0_13 = arith.constant 0 : index
    %19 = vector.load %arg5[%c0_12, %c0_13] : memref<8x2xf32, #tpu.memory_space<vmem>>, vector<8x2xf32>
    tpu.vector_store %arg5[%c0_12, %c0_13], %18 {strides = array<i32>} : memref<8x2xf32, #tpu.memory_space<vmem>>, vector<8x2xf32>,
    return
  }
  func.func @transform_0(%arg0: i32) -> (i32, i32) {
    %c0_i32 = arith.constant 0 : i32
    %c0_i32_0 = arith.constant 0 : i32
    return %c0_i32, %arg0 : i32, i32
  }
  func.func @transform_1(%arg0: i32) -> (i32, i32) {
    %c0_i32 = arith.constant 0 : i32
    %c0_i32_0 = arith.constant 0 : i32
    %c0_i32_1 = arith.constant 0 : i32
    return %c0_i32, %c0_i32_0 : i32, i32
  }
  func.func @transform_2(%arg0: i32) -> (i32, i32) {
    %c0_i32 = arith.constant 0 : i32
    %c0_i32_0 = arith.constant 0 : i32
    return %c0_i32, %arg0 : i32, i32
  }
  func.func @transform_3(%arg0: i32) -> (i32, i32) {
    %c0_i32 = arith.constant 0 : i32
    %c0_i32_0 = arith.constant 0 : i32
    return %c0_i32, %arg0 : i32, i32
  }
  func.func @transform_4(%arg0: i32) -> (i32, i32) {
    %c0_i32 = arith.constant 0 : i32
    %c0_i32_0 = arith.constant 0 : i32
    %c0_i32_1 = arith.constant 0 : i32
    return %c0_i32, %c0_i32_0 : i32, i32
  }
}

module attributes {stable_mosaic.version = 11 : i64} {
  func.func @_bn_apply_kernel(%arg0: i32, %arg1: memref<8x512xf32, #tpu.memory_space<vmem>>, %arg2: memref<8x2xf32, #tpu.memory_space<vmem>>, %arg3: memref<8x1xf32, #tpu.memory_space<vmem>>, %arg4: memref<8x1xf32, #tpu.memory_space<vmem>>, %arg5: memref<1x512xf32, #tpu.memory_space<vmem>>, %arg6: memref<8x512xf32, #tpu.memory_space<vmem>>) attributes {dimension_semantics = [#tpu.dimension_semantics<parallel>], iteration_bounds = array<i64: 2>, scalar_prefetch = 0 : i64, scratch_operands = 0 : i64, tpu.core_type = #tpu.core_type<tc>, window_params = [{transform_indices = @transform_0, window_bounds = array<i64: 8, 512>}, {pipeline_mode = #tpu.pipeline_mode<synchronous>, transform_indices = @transform_1, window_bounds = array<i64: 8, 2>}, {pipeline_mode = #tpu.pipeline_mode<synchronous>, transform_indices = @transform_2, window_bounds = array<i64: 8, 1>}, {pipeline_mode = #tpu.pipeline_mode<synchronous>, transform_indices = @transform_3, window_bounds = array<i64: 8, 1>}, {transform_indices = @transform_4, window_bounds = array<i64: 1, 512>}, {transform_indices = @transform_5, window_bounds = array<i64: 8, 512>}]} {
    %c0 = arith.constant 0 : index
    %c0_0 = arith.constant 0 : index
    %0 = vector.load %arg2[%c0, %c0_0] : memref<8x2xf32, #tpu.memory_space<vmem>>, vector<8x2xf32>
    %1 = vector.extract_strided_slice %0 {offsets = [0, 0], sizes = [8, 1], strides = [1, 1]} : vector<8x2xf32> to vector<8x1xf32>
    %cst = arith.constant 0.001953125 : f32
    %2 = vector.broadcast %cst : f32 to vector<8x1xf32>
    %3 = arith.mulf %1, %2 : vector<8x1xf32>
    %4 = vector.extract_strided_slice %0 {offsets = [0, 1], sizes = [8, 1], strides = [1, 1]} : vector<8x2xf32> to vector<8x1xf32>
    %cst_1 = arith.constant 0.001953125 : f32
    %5 = vector.broadcast %cst_1 : f32 to vector<8x1xf32>
    %6 = arith.mulf %4, %5 : vector<8x1xf32>
    %7 = arith.mulf %3, %3 : vector<8x1xf32>
    %8 = arith.subf %6, %7 : vector<8x1xf32>
    %cst_2 = arith.constant 0.000000e+00 : f32
    %9 = vector.broadcast %cst_2 : f32 to vector<8x1xf32>
    %10 = arith.maximumf %8, %9 : vector<8x1xf32>
    %c0_3 = arith.constant 0 : index
    %c0_4 = arith.constant 0 : index
    %11 = vector.load %arg1[%c0_3, %c0_4] : memref<8x512xf32, #tpu.memory_space<vmem>>, vector<8x512xf32>
    %12 = vector.broadcast %3 : vector<8x1xf32> to vector<8x512xf32>
    %13 = arith.subf %11, %12 : vector<8x512xf32>
    %cst_5 = arith.constant 9.99999974E-6 : f32
    %14 = vector.broadcast %cst_5 : f32 to vector<8x1xf32>
    %15 = arith.addf %10, %14 : vector<8x1xf32>
    %16 = math.rsqrt %15 : vector<8x1xf32>
    %c0_6 = arith.constant 0 : index
    %c0_7 = arith.constant 0 : index
    %17 = vector.load %arg3[%c0_6, %c0_7] : memref<8x1xf32, #tpu.memory_space<vmem>>, vector<8x1xf32>
    %18 = arith.mulf %16, %17 : vector<8x1xf32>
    %19 = vector.broadcast %18 : vector<8x1xf32> to vector<8x512xf32>
    %20 = arith.mulf %13, %19 : vector<8x512xf32>
    %c0_8 = arith.constant 0 : index
    %c0_9 = arith.constant 0 : index
    %21 = vector.load %arg4[%c0_8, %c0_9] : memref<8x1xf32, #tpu.memory_space<vmem>>, vector<8x1xf32>
    %22 = vector.broadcast %21 : vector<8x1xf32> to vector<8x512xf32>
    %23 = arith.addf %20, %22 : vector<8x512xf32>
    %cst_10 = arith.constant 0.000000e+00 : f32
    %24 = vector.broadcast %cst_10 : f32 to vector<8x512xf32>
    %25 = arith.cmpf oge, %23, %24 : vector<8x512xf32>
    %cst_11 = arith.constant 2.000000e-01 : f32
    %26 = vector.broadcast %cst_11 : f32 to vector<8x512xf32>
    %27 = arith.mulf %26, %23 : vector<8x512xf32>
    %28 = arith.select %25, %23, %27 : vector<8x512xi1>, vector<8x512xf32>
    %c0_12 = arith.constant 0 : index
    %c0_13 = arith.constant 0 : index
    %29 = vector.load %arg5[%c0_12, %c0_13] : memref<1x512xf32, #tpu.memory_space<vmem>>, vector<1x512xf32>
    %30 = vector.broadcast %29 : vector<1x512xf32> to vector<8x512xf32>
    %31 = arith.mulf %28, %30 : vector<8x512xf32>
    %c0_14 = arith.constant 0 : index
    %c0_15 = arith.constant 0 : index
    %32 = vector.load %arg6[%c0_14, %c0_15] : memref<8x512xf32, #tpu.memory_space<vmem>>, vector<8x512xf32>
    tpu.vector_store %arg6[%c0_14, %c0_15], %31 {strides = array<i32>} : memref<8x512xf32, #tpu.memory_space<vmem>>, vector<8x512xf32>,
    return
  }
  func.func @transform_0(%arg0: i32) -> (i32, i32) {
    %c0_i32 = arith.constant 0 : i32
    %c0_i32_0 = arith.constant 0 : i32
    return %c0_i32, %arg0 : i32, i32
  }
  func.func @transform_1(%arg0: i32) -> (i32, i32) {
    %c0_i32 = arith.constant 0 : i32
    %c0_i32_0 = arith.constant 0 : i32
    %c0_i32_1 = arith.constant 0 : i32
    return %c0_i32, %c0_i32_0 : i32, i32
  }
  func.func @transform_2(%arg0: i32) -> (i32, i32) {
    %c0_i32 = arith.constant 0 : i32
    %c0_i32_0 = arith.constant 0 : i32
    %c0_i32_1 = arith.constant 0 : i32
    return %c0_i32, %c0_i32_0 : i32, i32
  }
  func.func @transform_3(%arg0: i32) -> (i32, i32) {
    %c0_i32 = arith.constant 0 : i32
    %c0_i32_0 = arith.constant 0 : i32
    %c0_i32_1 = arith.constant 0 : i32
    return %c0_i32, %c0_i32_0 : i32, i32
  }
  func.func @transform_4(%arg0: i32) -> (i32, i32) {
    %c0_i32 = arith.constant 0 : i32
    %c0_i32_0 = arith.constant 0 : i32
    return %c0_i32, %arg0 : i32, i32
  }
  func.func @transform_5(%arg0: i32) -> (i32, i32) {
    %c0_i32 = arith.constant 0 : i32
    %c0_i32_0 = arith.constant 0 : i32
    return %c0_i32, %arg0 : i32, i32
  }
}

module attributes {stable_mosaic.version = 11 : i64} {
  func.func @_conv_stats_halo_kernel(%arg0: i32, %arg1: memref<4x512xf32, #tpu.memory_space<vmem>>, %arg2: memref<4x128xf32, #tpu.memory_space<vmem>>, %arg3: memref<4x128xf32, #tpu.memory_space<vmem>>, %arg4: memref<8x36xbf16, #tpu.memory_space<vmem>>, %arg5: memref<1x512xf32, #tpu.memory_space<vmem>>, %arg6: memref<8x512xf32, #tpu.memory_space<vmem>>, %arg7: memref<8x2xf32, #tpu.memory_space<vmem>>) attributes {dimension_semantics = [#tpu.dimension_semantics<arbitrary>], iteration_bounds = array<i64: 2>, scalar_prefetch = 0 : i64, scratch_operands = 0 : i64, tpu.core_type = #tpu.core_type<tc>, window_params = [{transform_indices = @transform_0, window_bounds = array<i64: 4, 512>}, {transform_indices = @transform_1, window_bounds = array<i64: 4, 128>}, {transform_indices = @transform_2, window_bounds = array<i64: 4, 128>}, {pipeline_mode = #tpu.pipeline_mode<synchronous>, transform_indices = @transform_3, window_bounds = array<i64: 8, 36>}, {transform_indices = @transform_4, window_bounds = array<i64: 1, 512>}, {transform_indices = @transform_5, window_bounds = array<i64: 8, 512>}, {pipeline_mode = #tpu.pipeline_mode<synchronous>, transform_indices = @transform_6, window_bounds = array<i64: 8, 2>}]} {
    %c0_i32 = arith.constant 0 : i32
    %0 = arith.cmpi eq, %arg0, %c0_i32 : i32
    %1 = arith.extui %0 : i1 to i32
    %c0_i32_0 = arith.constant 0 : i32
    %2 = arith.cmpi ne, %1, %c0_i32_0 : i32
    scf.if %2 {
      %cst_18 = arith.constant 0.000000e+00 : f32
      %33 = vector.broadcast %cst_18 : f32 to vector<8x2xf32>
      %c0_19 = arith.constant 0 : index
      %c0_20 = arith.constant 0 : index
      %34 = vector.load %arg7[%c0_19, %c0_20] : memref<8x2xf32, #tpu.memory_space<vmem>>, vector<8x2xf32>
      tpu.vector_store %arg7[%c0_19, %c0_20], %33 {strides = array<i32>} : memref<8x2xf32, #tpu.memory_space<vmem>>, vector<8x2xf32>,
    } else {
    }
    %c0 = arith.constant 0 : index
    %c0_1 = arith.constant 0 : index
    %3 = vector.load %arg2[%c0, %c0_1] : memref<4x128xf32, #tpu.memory_space<vmem>>, vector<4x128xf32>
    %c0_2 = arith.constant 0 : index
    %c0_3 = arith.constant 0 : index
    %4 = vector.load %arg1[%c0_2, %c0_3] : memref<4x512xf32, #tpu.memory_space<vmem>>, vector<4x512xf32>
    %c0_4 = arith.constant 0 : index
    %c0_5 = arith.constant 0 : index
    %5 = vector.load %arg3[%c0_4, %c0_5] : memref<4x128xf32, #tpu.memory_space<vmem>>, vector<4x128xf32>
    %6 = tpu.concatenate %3, %4, %5 in 1 : vector<4x128xf32>, vector<4x512xf32>, vector<4x128xf32> -> vector<4x768xf32>
    %7 = arith.truncf %6 : vector<4x768xf32> to vector<4x768xbf16>
    %8 = vector.extract_strided_slice %7 {offsets = [0, 109], sizes = [4, 512], strides = [1, 1]} : vector<4x768xbf16> to vector<4x512xbf16>
    %9 = vector.extract_strided_slice %7 {offsets = [0, 110], sizes = [4, 512], strides = [1, 1]} : vector<4x768xbf16> to vector<4x512xbf16>
    %10 = vector.extract_strided_slice %7 {offsets = [0, 111], sizes = [4, 512], strides = [1, 1]} : vector<4x768xbf16> to vector<4x512xbf16>
    %11 = vector.extract_strided_slice %7 {offsets = [0, 127], sizes = [4, 512], strides = [1, 1]} : vector<4x768xbf16> to vector<4x512xbf16>
    %12 = vector.extract_strided_slice %7 {offsets = [0, 128], sizes = [4, 512], strides = [1, 1]} : vector<4x768xbf16> to vector<4x512xbf16>
    %13 = vector.extract_strided_slice %7 {offsets = [0, 129], sizes = [4, 512], strides = [1, 1]} : vector<4x768xbf16> to vector<4x512xbf16>
    %14 = vector.extract_strided_slice %7 {offsets = [0, 145], sizes = [4, 512], strides = [1, 1]} : vector<4x768xbf16> to vector<4x512xbf16>
    %15 = vector.extract_strided_slice %7 {offsets = [0, 146], sizes = [4, 512], strides = [1, 1]} : vector<4x768xbf16> to vector<4x512xbf16>
    %16 = vector.extract_strided_slice %7 {offsets = [0, 147], sizes = [4, 512], strides = [1, 1]} : vector<4x768xbf16> to vector<4x512xbf16>
    %17 = tpu.concatenate %8, %9, %10, %11, %12, %13, %14, %15, %16 in 0 : vector<4x512xbf16>, vector<4x512xbf16>, vector<4x512xbf16>, vector<4x512xbf16>, vector<4x512xbf16>, vector<4x512xbf16>, vector<4x512xbf16>, vector<4x512xbf16>, vector<4x512xbf16> -> vector<36x512xbf16>
    %c0_6 = arith.constant 0 : index
    %c0_7 = arith.constant 0 : index
    %18 = vector.load %arg4[%c0_6, %c0_7] : memref<8x36xbf16, #tpu.memory_space<vmem>>, vector<8x36xbf16>
    %cst = arith.constant dense<0.000000e+00> : vector<8x512xf32>
    %19 = tpu.matmul %18, %17, %cst {dimension_numbers = #tpu.dot_dimension_numbers<[1], [0], [0], [1], [0, 0, 1, 1], [], []>} : vector<8x36xbf16>, vector<36x512xbf16>, vector<8x512xf32> -> vector<8x512xf32>
    %c0_8 = arith.constant 0 : index
    %c0_9 = arith.constant 0 : index
    %20 = vector.load %arg6[%c0_8, %c0_9] : memref<8x512xf32, #tpu.memory_space<vmem>>, vector<8x512xf32>
    tpu.vector_store %arg6[%c0_8, %c0_9], %19 {strides = array<i32>} : memref<8x512xf32, #tpu.memory_space<vmem>>, vector<8x512xf32>,
    %c0_10 = arith.constant 0 : index
    %c0_11 = arith.constant 0 : index
    %21 = vector.load %arg5[%c0_10, %c0_11] : memref<1x512xf32, #tpu.memory_space<vmem>>, vector<1x512xf32>
    %22 = vector.broadcast %21 : vector<1x512xf32> to vector<8x512xf32>
    %23 = arith.mulf %19, %22 : vector<8x512xf32>
    %c0_12 = arith.constant 0 : index
    %c0_13 = arith.constant 0 : index
    %24 = vector.load %arg7[%c0_12, %c0_13] : memref<8x2xf32, #tpu.memory_space<vmem>>, vector<8x2xf32>
    %cst_14 = arith.constant dense<0.000000e+00> : vector<8xf32>
    %25 = vector.multi_reduction <add>, %23, %cst_14 [1] : vector<8x512xf32> to vector<8xf32>
    %26 = vector.shape_cast %25 : vector<8xf32> to vector<8x1xf32>
    %27 = arith.mulf %23, %19 : vector<8x512xf32>
    %cst_15 = arith.constant dense<0.000000e+00> : vector<8xf32>
    %28 = vector.multi_reduction <add>, %27, %cst_15 [1] : vector<8x512xf32> to vector<8xf32>
    %29 = vector.shape_cast %28 : vector<8xf32> to vector<8x1xf32>
    %30 = tpu.concatenate %26, %29 in 1 : vector<8x1xf32>, vector<8x1xf32> -> vector<8x2xf32>
    %31 = arith.addf %24, %30 : vector<8x2xf32>
    %c0_16 = arith.constant 0 : index
    %c0_17 = arith.constant 0 : index
    %32 = vector.load %arg7[%c0_16, %c0_17] : memref<8x2xf32, #tpu.memory_space<vmem>>, vector<8x2xf32>
    tpu.vector_store %arg7[%c0_16, %c0_17], %31 {strides = array<i32>} : memref<8x2xf32, #tpu.memory_space<vmem>>, vector<8x2xf32>,
    return
  }
  func.func @transform_0(%arg0: i32) -> (i32, i32) {
    %c0_i32 = arith.constant 0 : i32
    %c0_i32_0 = arith.constant 0 : i32
    return %c0_i32, %arg0 : i32, i32
  }
  func.func @transform_1(%arg0: i32) -> (i32, i32) {
    %c4_i32 = arith.constant 4 : i32
    %0 = arith.muli %arg0, %c4_i32 : i32
    %c1_i32 = arith.constant 1 : i32
    %1 = arith.subi %0, %c1_i32 : i32
    %c0_i32 = arith.constant 0 : i32
    %2 = arith.maxsi %1, %c0_i32 : i32
    %c0_i32_0 = arith.constant 0 : i32
    %c0_i32_1 = arith.constant 0 : i32
    return %c0_i32_0, %2 : i32, i32
  }
  func.func @transform_2(%arg0: i32) -> (i32, i32) {
    %c4_i32 = arith.constant 4 : i32
    %0 = arith.muli %arg0, %c4_i32 : i32
    %c4_i32_0 = arith.constant 4 : i32
    %1 = arith.addi %0, %c4_i32_0 : i32
    %c7_i32 = arith.constant 7 : i32
    %2 = arith.minsi %1, %c7_i32 : i32
    %c0_i32 = arith.constant 0 : i32
    %c0_i32_1 = arith.constant 0 : i32
    return %c0_i32, %2 : i32, i32
  }
  func.func @transform_3(%arg0: i32) -> (i32, i32) {
    %c0_i32 = arith.constant 0 : i32
    %c0_i32_0 = arith.constant 0 : i32
    %c0_i32_1 = arith.constant 0 : i32
    return %c0_i32, %c0_i32_0 : i32, i32
  }
  func.func @transform_4(%arg0: i32) -> (i32, i32) {
    %c0_i32 = arith.constant 0 : i32
    %c0_i32_0 = arith.constant 0 : i32
    return %c0_i32, %arg0 : i32, i32
  }
  func.func @transform_5(%arg0: i32) -> (i32, i32) {
    %c0_i32 = arith.constant 0 : i32
    %c0_i32_0 = arith.constant 0 : i32
    return %c0_i32, %arg0 : i32, i32
  }
  func.func @transform_6(%arg0: i32) -> (i32, i32) {
    %c0_i32 = arith.constant 0 : i32
    %c0_i32_0 = arith.constant 0 : i32
    %c0_i32_1 = arith.constant 0 : i32
    return %c0_i32, %c0_i32_0 : i32, i32
  }
}

module attributes {stable_mosaic.version = 11 : i64} {
  func.func @_conv_stats_halo_kernel(%arg0: i32, %arg1: memref<8x512xf32, #tpu.memory_space<vmem>>, %arg2: memref<8x128xf32, #tpu.memory_space<vmem>>, %arg3: memref<8x128xf32, #tpu.memory_space<vmem>>, %arg4: memref<8x72xbf16, #tpu.memory_space<vmem>>, %arg5: memref<1x512xf32, #tpu.memory_space<vmem>>, %arg6: memref<8x512xf32, #tpu.memory_space<vmem>>, %arg7: memref<8x2xf32, #tpu.memory_space<vmem>>) attributes {dimension_semantics = [#tpu.dimension_semantics<arbitrary>], iteration_bounds = array<i64: 2>, scalar_prefetch = 0 : i64, scratch_operands = 0 : i64, tpu.core_type = #tpu.core_type<tc>, window_params = [{transform_indices = @transform_0, window_bounds = array<i64: 8, 512>}, {transform_indices = @transform_1, window_bounds = array<i64: 8, 128>}, {transform_indices = @transform_2, window_bounds = array<i64: 8, 128>}, {pipeline_mode = #tpu.pipeline_mode<synchronous>, transform_indices = @transform_3, window_bounds = array<i64: 8, 72>}, {transform_indices = @transform_4, window_bounds = array<i64: 1, 512>}, {transform_indices = @transform_5, window_bounds = array<i64: 8, 512>}, {pipeline_mode = #tpu.pipeline_mode<synchronous>, transform_indices = @transform_6, window_bounds = array<i64: 8, 2>}]} {
    %c0_i32 = arith.constant 0 : i32
    %0 = arith.cmpi eq, %arg0, %c0_i32 : i32
    %1 = arith.extui %0 : i1 to i32
    %c0_i32_0 = arith.constant 0 : i32
    %2 = arith.cmpi ne, %1, %c0_i32_0 : i32
    scf.if %2 {
      %cst_18 = arith.constant 0.000000e+00 : f32
      %33 = vector.broadcast %cst_18 : f32 to vector<8x2xf32>
      %c0_19 = arith.constant 0 : index
      %c0_20 = arith.constant 0 : index
      %34 = vector.load %arg7[%c0_19, %c0_20] : memref<8x2xf32, #tpu.memory_space<vmem>>, vector<8x2xf32>
      tpu.vector_store %arg7[%c0_19, %c0_20], %33 {strides = array<i32>} : memref<8x2xf32, #tpu.memory_space<vmem>>, vector<8x2xf32>,
    } else {
    }
    %c0 = arith.constant 0 : index
    %c0_1 = arith.constant 0 : index
    %3 = vector.load %arg2[%c0, %c0_1] : memref<8x128xf32, #tpu.memory_space<vmem>>, vector<8x128xf32>
    %c0_2 = arith.constant 0 : index
    %c0_3 = arith.constant 0 : index
    %4 = vector.load %arg1[%c0_2, %c0_3] : memref<8x512xf32, #tpu.memory_space<vmem>>, vector<8x512xf32>
    %c0_4 = arith.constant 0 : index
    %c0_5 = arith.constant 0 : index
    %5 = vector.load %arg3[%c0_4, %c0_5] : memref<8x128xf32, #tpu.memory_space<vmem>>, vector<8x128xf32>
    %6 = tpu.concatenate %3, %4, %5 in 1 : vector<8x128xf32>, vector<8x512xf32>, vector<8x128xf32> -> vector<8x768xf32>
    %7 = arith.truncf %6 : vector<8x768xf32> to vector<8x768xbf16>
    %8 = vector.extract_strided_slice %7 {offsets = [0, 109], sizes = [8, 512], strides = [1, 1]} : vector<8x768xbf16> to vector<8x512xbf16>
    %9 = vector.extract_strided_slice %7 {offsets = [0, 110], sizes = [8, 512], strides = [1, 1]} : vector<8x768xbf16> to vector<8x512xbf16>
    %10 = vector.extract_strided_slice %7 {offsets = [0, 111], sizes = [8, 512], strides = [1, 1]} : vector<8x768xbf16> to vector<8x512xbf16>
    %11 = vector.extract_strided_slice %7 {offsets = [0, 127], sizes = [8, 512], strides = [1, 1]} : vector<8x768xbf16> to vector<8x512xbf16>
    %12 = vector.extract_strided_slice %7 {offsets = [0, 128], sizes = [8, 512], strides = [1, 1]} : vector<8x768xbf16> to vector<8x512xbf16>
    %13 = vector.extract_strided_slice %7 {offsets = [0, 129], sizes = [8, 512], strides = [1, 1]} : vector<8x768xbf16> to vector<8x512xbf16>
    %14 = vector.extract_strided_slice %7 {offsets = [0, 145], sizes = [8, 512], strides = [1, 1]} : vector<8x768xbf16> to vector<8x512xbf16>
    %15 = vector.extract_strided_slice %7 {offsets = [0, 146], sizes = [8, 512], strides = [1, 1]} : vector<8x768xbf16> to vector<8x512xbf16>
    %16 = vector.extract_strided_slice %7 {offsets = [0, 147], sizes = [8, 512], strides = [1, 1]} : vector<8x768xbf16> to vector<8x512xbf16>
    %17 = tpu.concatenate %8, %9, %10, %11, %12, %13, %14, %15, %16 in 0 : vector<8x512xbf16>, vector<8x512xbf16>, vector<8x512xbf16>, vector<8x512xbf16>, vector<8x512xbf16>, vector<8x512xbf16>, vector<8x512xbf16>, vector<8x512xbf16>, vector<8x512xbf16> -> vector<72x512xbf16>
    %c0_6 = arith.constant 0 : index
    %c0_7 = arith.constant 0 : index
    %18 = vector.load %arg4[%c0_6, %c0_7] : memref<8x72xbf16, #tpu.memory_space<vmem>>, vector<8x72xbf16>
    %cst = arith.constant dense<0.000000e+00> : vector<8x512xf32>
    %19 = tpu.matmul %18, %17, %cst {dimension_numbers = #tpu.dot_dimension_numbers<[1], [0], [0], [1], [0, 0, 1, 1], [], []>} : vector<8x72xbf16>, vector<72x512xbf16>, vector<8x512xf32> -> vector<8x512xf32>
    %c0_8 = arith.constant 0 : index
    %c0_9 = arith.constant 0 : index
    %20 = vector.load %arg6[%c0_8, %c0_9] : memref<8x512xf32, #tpu.memory_space<vmem>>, vector<8x512xf32>
    tpu.vector_store %arg6[%c0_8, %c0_9], %19 {strides = array<i32>} : memref<8x512xf32, #tpu.memory_space<vmem>>, vector<8x512xf32>,
    %c0_10 = arith.constant 0 : index
    %c0_11 = arith.constant 0 : index
    %21 = vector.load %arg5[%c0_10, %c0_11] : memref<1x512xf32, #tpu.memory_space<vmem>>, vector<1x512xf32>
    %22 = vector.broadcast %21 : vector<1x512xf32> to vector<8x512xf32>
    %23 = arith.mulf %19, %22 : vector<8x512xf32>
    %c0_12 = arith.constant 0 : index
    %c0_13 = arith.constant 0 : index
    %24 = vector.load %arg7[%c0_12, %c0_13] : memref<8x2xf32, #tpu.memory_space<vmem>>, vector<8x2xf32>
    %cst_14 = arith.constant dense<0.000000e+00> : vector<8xf32>
    %25 = vector.multi_reduction <add>, %23, %cst_14 [1] : vector<8x512xf32> to vector<8xf32>
    %26 = vector.shape_cast %25 : vector<8xf32> to vector<8x1xf32>
    %27 = arith.mulf %23, %19 : vector<8x512xf32>
    %cst_15 = arith.constant dense<0.000000e+00> : vector<8xf32>
    %28 = vector.multi_reduction <add>, %27, %cst_15 [1] : vector<8x512xf32> to vector<8xf32>
    %29 = vector.shape_cast %28 : vector<8xf32> to vector<8x1xf32>
    %30 = tpu.concatenate %26, %29 in 1 : vector<8x1xf32>, vector<8x1xf32> -> vector<8x2xf32>
    %31 = arith.addf %24, %30 : vector<8x2xf32>
    %c0_16 = arith.constant 0 : index
    %c0_17 = arith.constant 0 : index
    %32 = vector.load %arg7[%c0_16, %c0_17] : memref<8x2xf32, #tpu.memory_space<vmem>>, vector<8x2xf32>
    tpu.vector_store %arg7[%c0_16, %c0_17], %31 {strides = array<i32>} : memref<8x2xf32, #tpu.memory_space<vmem>>, vector<8x2xf32>,
    return
  }
  func.func @transform_0(%arg0: i32) -> (i32, i32) {
    %c0_i32 = arith.constant 0 : i32
    %c0_i32_0 = arith.constant 0 : i32
    return %c0_i32, %arg0 : i32, i32
  }
  func.func @transform_1(%arg0: i32) -> (i32, i32) {
    %c4_i32 = arith.constant 4 : i32
    %0 = arith.muli %arg0, %c4_i32 : i32
    %c1_i32 = arith.constant 1 : i32
    %1 = arith.subi %0, %c1_i32 : i32
    %c0_i32 = arith.constant 0 : i32
    %2 = arith.maxsi %1, %c0_i32 : i32
    %c0_i32_0 = arith.constant 0 : i32
    %c0_i32_1 = arith.constant 0 : i32
    return %c0_i32_0, %2 : i32, i32
  }
  func.func @transform_2(%arg0: i32) -> (i32, i32) {
    %c4_i32 = arith.constant 4 : i32
    %0 = arith.muli %arg0, %c4_i32 : i32
    %c4_i32_0 = arith.constant 4 : i32
    %1 = arith.addi %0, %c4_i32_0 : i32
    %c7_i32 = arith.constant 7 : i32
    %2 = arith.minsi %1, %c7_i32 : i32
    %c0_i32 = arith.constant 0 : i32
    %c0_i32_1 = arith.constant 0 : i32
    return %c0_i32, %2 : i32, i32
  }
  func.func @transform_3(%arg0: i32) -> (i32, i32) {
    %c0_i32 = arith.constant 0 : i32
    %c0_i32_0 = arith.constant 0 : i32
    %c0_i32_1 = arith.constant 0 : i32
    return %c0_i32, %c0_i32_0 : i32, i32
  }
  func.func @transform_4(%arg0: i32) -> (i32, i32) {
    %c0_i32 = arith.constant 0 : i32
    %c0_i32_0 = arith.constant 0 : i32
    return %c0_i32, %arg0 : i32, i32
  }
  func.func @transform_5(%arg0: i32) -> (i32, i32) {
    %c0_i32 = arith.constant 0 : i32
    %c0_i32_0 = arith.constant 0 : i32
    return %c0_i32, %arg0 : i32, i32
  }
  func.func @transform_6(%arg0: i32) -> (i32, i32) {
    %c0_i32 = arith.constant 0 : i32
    %c0_i32_0 = arith.constant 0 : i32
    %c0_i32_1 = arith.constant 0 : i32
    return %c0_i32, %c0_i32_0 : i32, i32
  }
}

module attributes {stable_mosaic.version = 11 : i64} {
  func.func @_residual_stats_kernel(%arg0: i32, %arg1: memref<8x512xf32, #tpu.memory_space<vmem>>, %arg2: memref<8x2xf32, #tpu.memory_space<vmem>>, %arg3: memref<8x1xf32, #tpu.memory_space<vmem>>, %arg4: memref<8x1xf32, #tpu.memory_space<vmem>>, %arg5: memref<8x512xf32, #tpu.memory_space<vmem>>, %arg6: memref<8x2xf32, #tpu.memory_space<vmem>>, %arg7: memref<8x1xf32, #tpu.memory_space<vmem>>, %arg8: memref<8x1xf32, #tpu.memory_space<vmem>>, %arg9: memref<1x512xf32, #tpu.memory_space<vmem>>, %arg10: memref<8x512xf32, #tpu.memory_space<vmem>>, %arg11: memref<8x2xf32, #tpu.memory_space<vmem>>) attributes {dimension_semantics = [#tpu.dimension_semantics<arbitrary>], iteration_bounds = array<i64: 2>, scalar_prefetch = 0 : i64, scratch_operands = 0 : i64, tpu.core_type = #tpu.core_type<tc>, window_params = [{transform_indices = @transform_0, window_bounds = array<i64: 8, 512>}, {pipeline_mode = #tpu.pipeline_mode<synchronous>, transform_indices = @transform_1, window_bounds = array<i64: 8, 2>}, {pipeline_mode = #tpu.pipeline_mode<synchronous>, transform_indices = @transform_2, window_bounds = array<i64: 8, 1>}, {pipeline_mode = #tpu.pipeline_mode<synchronous>, transform_indices = @transform_3, window_bounds = array<i64: 8, 1>}, {transform_indices = @transform_4, window_bounds = array<i64: 8, 512>}, {pipeline_mode = #tpu.pipeline_mode<synchronous>, transform_indices = @transform_5, window_bounds = array<i64: 8, 2>}, {pipeline_mode = #tpu.pipeline_mode<synchronous>, transform_indices = @transform_6, window_bounds = array<i64: 8, 1>}, {pipeline_mode = #tpu.pipeline_mode<synchronous>, transform_indices = @transform_7, window_bounds = array<i64: 8, 1>}, {transform_indices = @transform_8, window_bounds = array<i64: 1, 512>}, {transform_indices = @transform_9, window_bounds = array<i64: 8, 512>}, {pipeline_mode = #tpu.pipeline_mode<synchronous>, transform_indices = @transform_10, window_bounds = array<i64: 8, 2>}]} {
    %c0_i32 = arith.constant 0 : i32
    %0 = arith.cmpi eq, %arg0, %c0_i32 : i32
    %1 = arith.extui %0 : i1 to i32
    %c0_i32_0 = arith.constant 0 : i32
    %2 = arith.cmpi ne, %1, %c0_i32_0 : i32
    scf.if %2 {
      %cst_35 = arith.constant 0.000000e+00 : f32
      %70 = vector.broadcast %cst_35 : f32 to vector<8x2xf32>
      %c0_36 = arith.constant 0 : index
      %c0_37 = arith.constant 0 : index
      %71 = vector.load %arg11[%c0_36, %c0_37] : memref<8x2xf32, #tpu.memory_space<vmem>>, vector<8x2xf32>
      tpu.vector_store %arg11[%c0_36, %c0_37], %70 {strides = array<i32>} : memref<8x2xf32, #tpu.memory_space<vmem>>, vector<8x2xf32>,
    } else {
    }
    %c0 = arith.constant 0 : index
    %c0_1 = arith.constant 0 : index
    %3 = vector.load %arg2[%c0, %c0_1] : memref<8x2xf32, #tpu.memory_space<vmem>>, vector<8x2xf32>
    %4 = vector.extract_strided_slice %3 {offsets = [0, 0], sizes = [8, 1], strides = [1, 1]} : vector<8x2xf32> to vector<8x1xf32>
    %cst = arith.constant 0.001953125 : f32
    %5 = vector.broadcast %cst : f32 to vector<8x1xf32>
    %6 = arith.mulf %4, %5 : vector<8x1xf32>
    %7 = vector.extract_strided_slice %3 {offsets = [0, 1], sizes = [8, 1], strides = [1, 1]} : vector<8x2xf32> to vector<8x1xf32>
    %cst_2 = arith.constant 0.001953125 : f32
    %8 = vector.broadcast %cst_2 : f32 to vector<8x1xf32>
    %9 = arith.mulf %7, %8 : vector<8x1xf32>
    %10 = arith.mulf %6, %6 : vector<8x1xf32>
    %11 = arith.subf %9, %10 : vector<8x1xf32>
    %cst_3 = arith.constant 0.000000e+00 : f32
    %12 = vector.broadcast %cst_3 : f32 to vector<8x1xf32>
    %13 = arith.maximumf %11, %12 : vector<8x1xf32>
    %c0_4 = arith.constant 0 : index
    %c0_5 = arith.constant 0 : index
    %14 = vector.load %arg1[%c0_4, %c0_5] : memref<8x512xf32, #tpu.memory_space<vmem>>, vector<8x512xf32>
    %15 = vector.broadcast %6 : vector<8x1xf32> to vector<8x512xf32>
    %16 = arith.subf %14, %15 : vector<8x512xf32>
    %cst_6 = arith.constant 9.99999974E-6 : f32
    %17 = vector.broadcast %cst_6 : f32 to vector<8x1xf32>
    %18 = arith.addf %13, %17 : vector<8x1xf32>
    %19 = math.rsqrt %18 : vector<8x1xf32>
    %c0_7 = arith.constant 0 : index
    %c0_8 = arith.constant 0 : index
    %20 = vector.load %arg3[%c0_7, %c0_8] : memref<8x1xf32, #tpu.memory_space<vmem>>, vector<8x1xf32>
    %21 = arith.mulf %19, %20 : vector<8x1xf32>
    %22 = vector.broadcast %21 : vector<8x1xf32> to vector<8x512xf32>
    %23 = arith.mulf %16, %22 : vector<8x512xf32>
    %c0_9 = arith.constant 0 : index
    %c0_10 = arith.constant 0 : index
    %24 = vector.load %arg4[%c0_9, %c0_10] : memref<8x1xf32, #tpu.memory_space<vmem>>, vector<8x1xf32>
    %25 = vector.broadcast %24 : vector<8x1xf32> to vector<8x512xf32>
    %26 = arith.addf %23, %25 : vector<8x512xf32>
    %cst_11 = arith.constant 0.000000e+00 : f32
    %27 = vector.broadcast %cst_11 : f32 to vector<8x512xf32>
    %28 = arith.cmpf oge, %26, %27 : vector<8x512xf32>
    %cst_12 = arith.constant 2.000000e-01 : f32
    %29 = vector.broadcast %cst_12 : f32 to vector<8x512xf32>
    %30 = arith.mulf %29, %26 : vector<8x512xf32>
    %31 = arith.select %28, %26, %30 : vector<8x512xi1>, vector<8x512xf32>
    %c0_13 = arith.constant 0 : index
    %c0_14 = arith.constant 0 : index
    %32 = vector.load %arg6[%c0_13, %c0_14] : memref<8x2xf32, #tpu.memory_space<vmem>>, vector<8x2xf32>
    %33 = vector.extract_strided_slice %32 {offsets = [0, 0], sizes = [8, 1], strides = [1, 1]} : vector<8x2xf32> to vector<8x1xf32>
    %cst_15 = arith.constant 0.001953125 : f32
    %34 = vector.broadcast %cst_15 : f32 to vector<8x1xf32>
    %35 = arith.mulf %33, %34 : vector<8x1xf32>
    %36 = vector.extract_strided_slice %32 {offsets = [0, 1], sizes = [8, 1], strides = [1, 1]} : vector<8x2xf32> to vector<8x1xf32>
    %cst_16 = arith.constant 0.001953125 : f32
    %37 = vector.broadcast %cst_16 : f32 to vector<8x1xf32>
    %38 = arith.mulf %36, %37 : vector<8x1xf32>
    %39 = arith.mulf %35, %35 : vector<8x1xf32>
    %40 = arith.subf %38, %39 : vector<8x1xf32>
    %cst_17 = arith.constant 0.000000e+00 : f32
    %41 = vector.broadcast %cst_17 : f32 to vector<8x1xf32>
    %42 = arith.maximumf %40, %41 : vector<8x1xf32>
    %c0_18 = arith.constant 0 : index
    %c0_19 = arith.constant 0 : index
    %43 = vector.load %arg5[%c0_18, %c0_19] : memref<8x512xf32, #tpu.memory_space<vmem>>, vector<8x512xf32>
    %44 = vector.broadcast %35 : vector<8x1xf32> to vector<8x512xf32>
    %45 = arith.subf %43, %44 : vector<8x512xf32>
    %cst_20 = arith.constant 9.99999974E-6 : f32
    %46 = vector.broadcast %cst_20 : f32 to vector<8x1xf32>
    %47 = arith.addf %42, %46 : vector<8x1xf32>
    %48 = math.rsqrt %47 : vector<8x1xf32>
    %c0_21 = arith.constant 0 : index
    %c0_22 = arith.constant 0 : index
    %49 = vector.load %arg7[%c0_21, %c0_22] : memref<8x1xf32, #tpu.memory_space<vmem>>, vector<8x1xf32>
    %50 = arith.mulf %48, %49 : vector<8x1xf32>
    %51 = vector.broadcast %50 : vector<8x1xf32> to vector<8x512xf32>
    %52 = arith.mulf %45, %51 : vector<8x512xf32>
    %c0_23 = arith.constant 0 : index
    %c0_24 = arith.constant 0 : index
    %53 = vector.load %arg8[%c0_23, %c0_24] : memref<8x1xf32, #tpu.memory_space<vmem>>, vector<8x1xf32>
    %54 = vector.broadcast %53 : vector<8x1xf32> to vector<8x512xf32>
    %55 = arith.addf %52, %54 : vector<8x512xf32>
    %56 = arith.addf %31, %55 : vector<8x512xf32>
    %c0_25 = arith.constant 0 : index
    %c0_26 = arith.constant 0 : index
    %57 = vector.load %arg10[%c0_25, %c0_26] : memref<8x512xf32, #tpu.memory_space<vmem>>, vector<8x512xf32>
    tpu.vector_store %arg10[%c0_25, %c0_26], %56 {strides = array<i32>} : memref<8x512xf32, #tpu.memory_space<vmem>>, vector<8x512xf32>,
    %c0_27 = arith.constant 0 : index
    %c0_28 = arith.constant 0 : index
    %58 = vector.load %arg9[%c0_27, %c0_28] : memref<1x512xf32, #tpu.memory_space<vmem>>, vector<1x512xf32>
    %59 = vector.broadcast %58 : vector<1x512xf32> to vector<8x512xf32>
    %60 = arith.mulf %56, %59 : vector<8x512xf32>
    %c0_29 = arith.constant 0 : index
    %c0_30 = arith.constant 0 : index
    %61 = vector.load %arg11[%c0_29, %c0_30] : memref<8x2xf32, #tpu.memory_space<vmem>>, vector<8x2xf32>
    %cst_31 = arith.constant dense<0.000000e+00> : vector<8xf32>
    %62 = vector.multi_reduction <add>, %60, %cst_31 [1] : vector<8x512xf32> to vector<8xf32>
    %63 = vector.shape_cast %62 : vector<8xf32> to vector<8x1xf32>
    %64 = arith.mulf %60, %56 : vector<8x512xf32>
    %cst_32 = arith.constant dense<0.000000e+00> : vector<8xf32>
    %65 = vector.multi_reduction <add>, %64, %cst_32 [1] : vector<8x512xf32> to vector<8xf32>
    %66 = vector.shape_cast %65 : vector<8xf32> to vector<8x1xf32>
    %67 = tpu.concatenate %63, %66 in 1 : vector<8x1xf32>, vector<8x1xf32> -> vector<8x2xf32>
    %68 = arith.addf %61, %67 : vector<8x2xf32>
    %c0_33 = arith.constant 0 : index
    %c0_34 = arith.constant 0 : index
    %69 = vector.load %arg11[%c0_33, %c0_34] : memref<8x2xf32, #tpu.memory_space<vmem>>, vector<8x2xf32>
    tpu.vector_store %arg11[%c0_33, %c0_34], %68 {strides = array<i32>} : memref<8x2xf32, #tpu.memory_space<vmem>>, vector<8x2xf32>,
    return
  }
  func.func @transform_0(%arg0: i32) -> (i32, i32) {
    %c0_i32 = arith.constant 0 : i32
    %c0_i32_0 = arith.constant 0 : i32
    return %c0_i32, %arg0 : i32, i32
  }
  func.func @transform_1(%arg0: i32) -> (i32, i32) {
    %c0_i32 = arith.constant 0 : i32
    %c0_i32_0 = arith.constant 0 : i32
    %c0_i32_1 = arith.constant 0 : i32
    return %c0_i32, %c0_i32_0 : i32, i32
  }
  func.func @transform_2(%arg0: i32) -> (i32, i32) {
    %c0_i32 = arith.constant 0 : i32
    %c0_i32_0 = arith.constant 0 : i32
    %c0_i32_1 = arith.constant 0 : i32
    return %c0_i32, %c0_i32_0 : i32, i32
  }
  func.func @transform_3(%arg0: i32) -> (i32, i32) {
    %c0_i32 = arith.constant 0 : i32
    %c0_i32_0 = arith.constant 0 : i32
    %c0_i32_1 = arith.constant 0 : i32
    return %c0_i32, %c0_i32_0 : i32, i32
  }
  func.func @transform_4(%arg0: i32) -> (i32, i32) {
    %c0_i32 = arith.constant 0 : i32
    %c0_i32_0 = arith.constant 0 : i32
    return %c0_i32, %arg0 : i32, i32
  }
  func.func @transform_5(%arg0: i32) -> (i32, i32) {
    %c0_i32 = arith.constant 0 : i32
    %c0_i32_0 = arith.constant 0 : i32
    %c0_i32_1 = arith.constant 0 : i32
    return %c0_i32, %c0_i32_0 : i32, i32
  }
  func.func @transform_6(%arg0: i32) -> (i32, i32) {
    %c0_i32 = arith.constant 0 : i32
    %c0_i32_0 = arith.constant 0 : i32
    %c0_i32_1 = arith.constant 0 : i32
    return %c0_i32, %c0_i32_0 : i32, i32
  }
  func.func @transform_7(%arg0: i32) -> (i32, i32) {
    %c0_i32 = arith.constant 0 : i32
    %c0_i32_0 = arith.constant 0 : i32
    %c0_i32_1 = arith.constant 0 : i32
    return %c0_i32, %c0_i32_0 : i32, i32
  }
  func.func @transform_8(%arg0: i32) -> (i32, i32) {
    %c0_i32 = arith.constant 0 : i32
    %c0_i32_0 = arith.constant 0 : i32
    return %c0_i32, %arg0 : i32, i32
  }
  func.func @transform_9(%arg0: i32) -> (i32, i32) {
    %c0_i32 = arith.constant 0 : i32
    %c0_i32_0 = arith.constant 0 : i32
    return %c0_i32, %arg0 : i32, i32
  }
  func.func @transform_10(%arg0: i32) -> (i32, i32) {
    %c0_i32 = arith.constant 0 : i32
    %c0_i32_0 = arith.constant 0 : i32
    %c0_i32_1 = arith.constant 0 : i32
    return %c0_i32, %c0_i32_0 : i32, i32
  }
}

</mosaic_0001>

<bundles_post_ra>
// kernel: up_res_layer_pallas.9
= control target key start
LH: loop header
LB: loop body
LE: loop exit
PB: predicated region body
PF: predicated region fallthrough
CT: control target
= control target key end

     0   :  { %s483_s15 = smov 0   ;;  %s531_s0 = inlined_call_operand.vmem [shape: f32[4,1024], index: 0, kind: input, shape index: {}]   ;;  %s532_s1 = inlined_call_operand.vmem [shape: bf16[8,4], index: 1, kind: input, shape index: {}]   ;;  %s533_s2 = inlined_call_operand.vmem [shape: f32[1,1024], index: 2, kind: input, shape index: {}]   ;;  %s534_s3 = inlined_call_operand.vmem [shape: f32[8,1024], index: 3, kind: output, shape index: {0}]   ;;  %s535_s4 = inlined_call_operand.vmem [shape: f32[8,2], index: 4, kind: output, shape index: {1}]  }
   0x1 LB: > { %s423_s16 = sadd.s32 4294967295, %s455_s15   ;;  %p427_p0 = scmp.ge.s32.totalorder %s455_s15, 1  ;;  %s455_s15 = sphi %s483_s15, %s15_s15  }
   0x2   : > { %p171_p1 = scmp.lt.s32.totalorder %s455_s15, 3 }
   0x4   : > { %p172_p2 = pnand %p427_p0, %p171_p1 }
   0x5   : > { %s428_s17 = sshll.u32 (!%p172_p2), %s423_s16, 2  ;;  %p433_p4 = scmp.ne.s32.totalorder (!%p172_p2), %s423_s16, 0 }
   0x6   : > { %175 = sbr.rel (%p172_p2) target bundleno = 300 (0x12c), region = 32  ;;  %p202_p3 = scmp.lt.s32.totalorder (!%p172_p2), %s428_s17, 7 }
   0xb   : > { %s537_s17 = smov (!%p202_p3, %s428_s17), 7  ;;  %222 = sbr.rel (%p433_p4) target bundleno = 18 (0x12), region = 36 }
   0xc   : > { %s429_s18 = sshll.u32 %s537_s17, 2  ;;  %s210_s21 = scalar_lea.vmem %s533_s2, %s537_s17 }
   0xd   : > { %s205_s24 = scalar_lea.vmem %s531_s0, %s429_s18  ;;  %s432_s25 = sshll.u32 %s537_s17, 3 }
   0xe   : > { %s505_s28 = scalar_lea.vmem %s534_s3, %s432_s25 }
  0x10   : > { %vm223_vm0 = vcmask 15360   ;;  %v457_v0 = vmov 0.0  }
  0x11   : > { %224 = vst.msk [vmem:[%s535_s4] sm:$0xff] %vm223_vm0, %v457_v0 }
  0x12 PF: > { %v226_v1 = vld [vmem:[%s205_s24] sm:$0xff]  ;;  %v227_v2 = vld [vmem:[%s205_s24 + $0x8] sm:$0xff]  ;;  %vm249_vm1 = vcmask 1041408   ;;  %vm245_vm2 = vcmask 31744   ;;  %vm347_vm3 = vcmask 7168   ;;  %vm350_vm4 = vcmask 15360  }
  0x13   : > { %230 = vst [vmem:[#allocation1] ss:$2 sm:$0xff] %v226_v1  ;;  %v225_v15 = vld [vmem:[%s532_s1] sm:$0xf] }
  0x14   : > { %232 = vst [vmem:[#allocation1 + $0x10] ss:$2 sm:$0xff] %v227_v2  ;;  %v318_v16 = vld [vmem:[%s210_s21] sm:$0xf] }
  0x15   : > { %v320_v18 = vperm.slane %v318_v16, 0  ;;  %v321_v20 = vperm.slane %v318_v16, 1  ;;  %v322_v23 = vperm.slane %v318_v16, 2  ;;  %v323_v24 = vperm.slane %v318_v16, 3 }
  0x18   : > { %v332_v44 = vld [vmem:[%s535_s4] sm:$0xff] }
  0x1a   : > { %v233_v3 = vld.sshfl [vmem:[#allocation1] sm:$0xff pattern:$0x75316420]  ;;  %v234_v4 = vld.sshfl [vmem:[#allocation1 + $0x8] sm:$0xff pattern:$0x75316420] }
  0x1b   : > { %v241_v5 = vpack.c.bf16 %v233_v3, %v233_v3  ;;  %v242_v6 = vpack.c.bf16 %v234_v4, %v234_v4  ;;  %v235_v7 = vld.sshfl [vmem:[#allocation1 + $0x10] sm:$0xff pattern:$0x75316420]  ;;  %v236_v8 = vld.sshfl [vmem:[#allocation1 + $0x18] sm:$0xff pattern:$0x75316420] }
  0x1c   : > { %v243_v9 = vpack.c.bf16 %v235_v7, %v235_v7  ;;  %v244_v10 = vpack.c.bf16 %v236_v8, %v236_v8 }
  0x1d   : > { %v251_v11 = vsel %vm249_vm1, %v241_v5, 0  ;;  %v254_v12 = vsel %vm249_vm1, %v242_v6, 0 }
  0x1e   : > { %269 = vmatpush.bf16.msra.mxu0 %v251_v11  ;;  %282 = vmatpush.bf16.msra.mxu1 %v254_v12  ;;  %v257_v13 = vsel %vm249_vm1, %v243_v9, 0  ;;  %v260_v14 = vsel %vm249_vm1, %v244_v10, 0 }
  0x1f   : > { %295 = vmatpush.bf16.msra.mxu2 %v257_v13  ;;  %308 = vmatpush.bf16.msra.mxu3 %v260_v14 }
  0x21   : > { %434 = vmatmul.msk.bf16.vlgmr.msra.gmra.mxu0 %vm245_vm2, %v225_v15  ;;  %435 = vmatmul.msk.bf16.vlgmr.msra.gmra.mxu1 %vm245_vm2, %v225_v15 }
  0x22   : > { %436 = vmatmul.msk.bf16.vlgmr.msra.gmra.mxu2 %vm245_vm2, %v225_v15  ;;  %437 = vmatmul.msk.bf16.vlgmr.msra.gmra.mxu3 %vm245_vm2, %v225_v15 }
  0x9e   : > { %v271_v17 = vpop.f32.mrf.mxu0  ;;  %v284_v19 = vpop.f32.mrf.mxu1 }
  0x9f   : > { %314 = vst [vmem:[%s505_s28] sm:$0xff] %v271_v17  ;;  %v328_v21 = vmul.f32 %v320_v18, %v271_v17  ;;  %v329_v22 = vmul.f32 %v321_v20, %v284_v19 }
  0xa0   : > { %315 = vst [vmem:[%s505_s28 + $0x8] sm:$0xff] %v284_v19 }
  0xa1   : > { %v333_v25 = vadd.f32 %v329_v22, %v328_v21  ;;  %v338_v31 = vmul.f32 %v328_v21, %v271_v17  ;;  %v339_v32 = vmul.f32 %v329_v22, %v284_v19 }
  0xa3   : > { %v342_v37 = vadd.f32 %v339_v32, %v338_v31 }
  0xa5   : > { %v297_v26 = vpop.f32.mrf.mxu2  ;;  %v310_v27 = vpop.f32.mrf.mxu3 }
  0xa6   : > { %316 = vst [vmem:[%s505_s28 + $0x10] sm:$0xff] %v297_v26  ;;  %v330_v28 = vmul.f32 %v322_v23, %v297_v26  ;;  %v273_v29 = vpop.f32.mrf.mxu0  ;;  %v286_v30 = vpop.f32.mrf.mxu1  ;;  %v331_v33 = vmul.f32 %v323_v24, %v310_v27 }
  0xa7   : > { %317 = vst [vmem:[%s505_s28 + $0x18] sm:$0xff] %v310_v27 }
  0xa8   : > { %v334_v34 = vadd.f32 %v333_v25, %v330_v28  ;;  %v340_v35 = vmul.f32 %v330_v28, %v297_v26  ;;  %v341_v41 = vmul.f32 %v331_v33, %v310_v27 }
  0xaa   : > { %v335_v36 = vadd.f32 %v334_v34, %v331_v33  ;;  %v343_v40 = vadd.f32 %v342_v37, %v340_v35 }
  0xac   : > { %336 = vadd.xlane.f32.xlu0 %v335_v36  ;;  %v344_v42 = vadd.f32 %v343_v40, %v341_v41 }
  0xad   : > { %v299_v38 = vpop.f32.mrf.mxu2  ;;  %v312_v39 = vpop.f32.mrf.mxu3 }
  0xb4   : > { %345 = vadd.xlane.f32.xlu0 %v344_v42 }
 0x11f   : > { %v337_v43 = vpop.xlane.xlu0 %336 }
 0x127   : > { %v346_v45 = vpop.xlane.xlu0 %345 }
 0x128   : > { %v348_v46 = vsel %vm347_vm3, %v337_v43, %v346_v45 }
 0x129   : > { %v349_v47 = vadd.f32 %v348_v46, %v332_v44 }
 0x12b   : > { %351 = vst.msk [vmem:[%s535_s4] sm:$0xff] %vm350_vm4, %v349_v47 }
 0x12c PF: > { %s15_s15 = sadd.s32 1, %s455_s15  }
 0x12d   : > { %p12_p5 = scmp.ge.s32.totalorder %s15_s15, 4  }
 0x12f   :  { %14 = sbr.rel (!%p12_p5) target bundleno = 1 (0x1), region = 78 }

// kernel: up_res_layer_pallas.7
= control target key start
LH: loop header
LB: loop body
LE: loop exit
PB: predicated region body
PF: predicated region fallthrough
CT: control target
= control target key end

     0   :  { %s470_s18 = smov 0   ;;  %s509_s0 = inlined_call_operand.vmem [shape: f32[8,1024], index: 0, kind: input, shape index: {}]   ;;  %s510_s1 = inlined_call_operand.vmem [shape: f32[8,2], index: 1, kind: input, shape index: {}]   ;;  %s511_s2 = inlined_call_operand.vmem [shape: f32[8,1], index: 2, kind: input, shape index: {}]   ;;  %s512_s3 = inlined_call_operand.vmem [shape: f32[8,1], index: 3, kind: input, shape index: {}]   ;;  %s513_s4 = inlined_call_operand.vmem [shape: f32[1,1024], index: 4, kind: input, shape index: {}]   ;;  %s514_s5 = inlined_call_operand.vmem [shape: f32[8,1024], index: 5, kind: output, shape index: {}]  }
   0x1 LB: > { %s400_s19 = sadd.s32 4294967295, %s435_s18   ;;  %p404_p0 = scmp.ge.s32.totalorder %s435_s18, 1  ;;  %s435_s18 = sphi %s470_s18, %s15_s18  }
   0x2   : > { %p198_p1 = scmp.lt.s32.totalorder %s435_s18, 3 }
   0x4   : > { %p199_p2 = pnand %p404_p0, %p198_p1 }
   0x5   : > { %s437_s22 = smov (!%p199_p2), 1   ;;  %s405_s27 = sshll.u32 (!%p199_p2), %s400_s19, 2 }
   0x6   : > { %202 = sbr.rel (%p199_p2) target bundleno = 286 (0x11e), region = 40  ;;  %p231_p3 = scmp.lt.s32.totalorder (!%p199_p2), %s405_s27, 7 }
   0xb   : > { %v247_v0 = vld [vmem:[%s510_s1] sm:$0xff]  ;;  %v438_v4 = vmov 0   ;;  %v439_v5 = vmov 1   ;;  %s516_s27 = smov (!%p231_p3, %s405_s27), 7 }
   0xc   : > { %v248_v1 = vmul.f32 0.001953125, %v247_v0  ;;  %v280_v3 = vld [vmem:[%s511_s2] sm:$0xff]  ;;  %423 = vset.pattern.permute.xlu1 %v438_v4  ;;  %425 = vset.pattern.permute.xlu2 %v438_v4  ;;  %s406_s28 = sshll.u32 %s516_s27, 3  ;;  %s239_s9 = scalar_lea.vmem %s513_s4, %s516_s27 }
   0xd   : > { %426 = vset.pattern.permute.xlu0 %v438_v4  ;;  %v295_v6 = vld [vmem:[%s512_s3] sm:$0xff]  ;;  %s234_s6 = scalar_lea.vmem %s509_s0, %s406_s28  ;;  %s245_s12 = scalar_lea.vmem %s514_s5, %s406_s28 }
   0xe   : > { %v249_v2 = vmul.f32 %v248_v1, %v248_v1  ;;  %262 = vperm.xlu1 %423, %v248_v1   ;;  %298 = vperm.xlu2 %425, %v295_v6   ;;  %v256_v21 = vld [vmem:[%s234_s6] sm:$0xff]  ;;  %v257_v22 = vld [vmem:[%s234_s6 + $0x8] sm:$0xff]  ;;  %v258_v23 = vld [vmem:[%s234_s6 + $0x10] sm:$0xff] }
   0xf   : > { %v259_v24 = vld [vmem:[%s234_s6 + $0x18] sm:$0xff]  ;;  %v317_v35 = vld [vmem:[%s239_s9] sm:$0xf] }
  0x10   : > { %251 = vrot.lane.b32.xlu0 %v249_v2, %s437_s22  ;;  %v319_v40 = vperm.slane %v317_v35, 0  ;;  %v320_v41 = vperm.slane %v317_v35, 1  ;;  %v321_v46 = vperm.slane %v317_v35, 2  ;;  %v322_v50 = vperm.slane %v317_v35, 3 }
  0x16   : > { %424 = vset.pattern.permute.xlu1 %v439_v5 }
  0x18   : > { %282 = vrot.lane.b32.xlu0 %v280_v3, %s437_s22 }
  0x68   : > { %v299_v30 = vpop.permute.xlu2 %298 }
  0x80   : > { %v263_v20 = vpop.permute.xlu1 %262 }
  0x81   : > { %v265_v25 = vsub.f32 %v256_v21, %v263_v20  ;;  %v266_v26 = vsub.f32 %v257_v22, %v263_v20  ;;  %v267_v27 = vsub.f32 %v258_v23, %v263_v20  ;;  %v268_v28 = vsub.f32 %v259_v24, %v263_v20 }
  0x82   : > { %v252_v7 = vpop.permute.xlu0 %251 }
  0x83   : > { %v254_v8 = vsub.f32 %v248_v1, %v252_v7 }
  0x85   : > { %v255_v9 = vmax.f32 %v254_v8, 0.0 }
  0x87   : > { %v269_v10 = vadd.f32 1e-05, %v255_v9 }
  0x89   : > { %427 = vrsqrt.f32 %v269_v10  ;;  %vm276_vm1 = vweird.f32 %v269_v10 }
  0x8a   : > { %v283_v17 = vpop.permute.xlu0 %282 }
  0x8f   : > { %v428_v11 = vpop.eup %427 }
  0x90   : > { %v271_v12 = vmul.f32 %v428_v11, %v269_v10  ;;  %vm277_vm0 = vweird.f32 %v428_v11 }
  0x91   : > { %vm278_vm2 = vmor %vm276_vm1, %vm277_vm0 }
  0x92   : > { %v272_v13 = vmul.f32 %v428_v11, %v271_v12 }
  0x94   : > { %v273_v14 = vmul.f32 0.5, %v272_v13 }
  0x96   : > { %v274_v15 = vsub.f32 1.5, %v273_v14 }
  0x98   : > { %v275_v16 = vmul.f32 %v428_v11, %v274_v15 }
  0x9a   : > { %v279_v18 = vsel %vm278_vm2, %v428_v11, %v275_v16 }
  0x9b   : > { %v285_v19 = vmul.f32 %v283_v17, %v279_v18 }
  0x9d   : > { %288 = vperm.xlu1 %424, %v285_v19  }
 0x10f   : > { %v289_v29 = vpop.permute.xlu1 %288 }
 0x110   : > { %v291_v31 = vmul.f32 %v289_v29, %v265_v25  ;;  %v292_v32 = vmul.f32 %v289_v29, %v266_v26  ;;  %v293_v33 = vmul.f32 %v289_v29, %v267_v27  ;;  %v294_v34 = vmul.f32 %v289_v29, %v268_v28 }
 0x112   : > { %v301_v36 = vadd.f32 %v299_v30, %v291_v31  ;;  %v302_v37 = vadd.f32 %v299_v30, %v292_v32  ;;  %v303_v38 = vadd.f32 %v299_v30, %v293_v33  ;;  %v304_v39 = vadd.f32 %v299_v30, %v294_v34 }
 0x114   : > { %vm305_vm3 = vcmp.ge.f32.partialorder %v301_v36, 0.0  ;;  %vm306_vm4 = vcmp.ge.f32.partialorder %v302_v37, 0.0  ;;  %vm307_vm5 = vcmp.ge.f32.partialorder %v303_v38, 0.0  ;;  %vm308_vm6 = vcmp.ge.f32.partialorder %v304_v39, 0.0 }
 0x115   : > { %v309_v42 = vmul.f32 0.2, %v301_v36  ;;  %v310_v43 = vmul.f32 0.2, %v302_v37  ;;  %v311_v44 = vmul.f32 0.2, %v303_v38 }
 0x116   : > { %v312_v45 = vmul.f32 0.2, %v304_v39 }
 0x117   : > { %v313_v47 = vsel %vm305_vm3, %v301_v36, %v309_v42  ;;  %v314_v48 = vsel %vm306_vm4, %v302_v37, %v310_v43  ;;  %v315_v49 = vsel %vm307_vm5, %v303_v38, %v311_v44 }
 0x118   : > { %v316_v51 = vsel %vm308_vm6, %v304_v39, %v312_v45  ;;  %v327_v52 = vmul.f32 %v319_v40, %v313_v47  ;;  %v328_v53 = vmul.f32 %v320_v41, %v314_v48  ;;  %v329_v54 = vmul.f32 %v321_v46, %v315_v49 }
 0x119   : > { %v330_v55 = vmul.f32 %v322_v50, %v316_v51 }
 0x11a   : > { %331 = vst [vmem:[%s245_s12] sm:$0xff] %v327_v52 }
 0x11b   : > { %332 = vst [vmem:[%s245_s12 + $0x8] sm:$0xff] %v328_v53 }
 0x11c   : > { %333 = vst [vmem:[%s245_s12 + $0x10] sm:$0xff] %v329_v54 }
 0x11d   : > { %334 = vst [vmem:[%s245_s12 + $0x18] sm:$0xff] %v330_v55 }
 0x11e PF: > { %s15_s18 = sadd.s32 1, %s435_s18  }
 0x11f   : > { %p12_p4 = scmp.ge.s32.totalorder %s15_s18, 4  }
 0x121   :  { %14 = sbr.rel (!%p12_p4) target bundleno = 1 (0x1), region = 73 }

// kernel: up_res_layer_pallas.8
= control target key start
LH: loop header
LB: loop body
LE: loop exit
PB: predicated region body
PF: predicated region fallthrough
CT: control target
= control target key end

     0   :  { %s993_s21 = smov 0   ;;  %s1209_s0 = inlined_call_operand.vmem [shape: f32[8,1024], index: 0, kind: input, shape index: {}, may-alias: {0,1,2}]   ;;  %s1210_s1 = inlined_call_operand.vmem [shape: f32[8,1024], index: 1, kind: input, shape index: {}, may-alias: {0,1,2}]   ;;  %s1211_s2 = inlined_call_operand.vmem [shape: f32[8,1024], index: 2, kind: input, shape index: {}, may-alias: {0,1,2}]   ;;  %s1212_s3 = inlined_call_operand.vmem [shape: bf16[8,72], index: 3, kind: input, shape index: {}]   ;;  %s1213_s4 = inlined_call_operand.vmem [shape: f32[1,1024], index: 4, kind: input, shape index: {}]   ;;  %s1214_s5 = inlined_call_operand.vmem [shape: f32[8,1024], index: 5, kind: output, shape index: {0}]   ;;  %s1215_s6 = inlined_call_operand.vmem [shape: f32[8,2], index: 6, kind: output, shape index: {1}]  }
   0x1 LB: > { %s880_s22 = sadd.s32 4294967295, %s946_s21   ;;  %p890_p0 = scmp.ge.s32.totalorder %s946_s21, 1  ;;  %s946_s21 = sphi %s993_s21, %s17_s21  }
   0x2   : > { %p271_p1 = scmp.lt.s32.totalorder %s946_s21, 3 }
   0x4   : > { %p272_p2 = pnand %p890_p0, %p271_p1 }
   0x5   : > { %s891_s23 = sshll.u32 (!%p272_p2), %s880_s22, 2  ;;  %p909_p7 = scmp.ne.s32.totalorder (!%p272_p2), %s880_s22, 0 }
   0x6   : > { %275 = sbr.rel (%p272_p2) target bundleno = 628 (0x274), region = 40  ;;  %p322_p3 = scmp.lt.s32.totalorder (!%p272_p2), %s891_s23, 7 }
   0x7   : > { %s894_s24 = sadd.s32 (!%p272_p2), 4294967295, %s891_s23  ;;  %s340_s27 = sadd.s32 (!%p272_p2), 4, %s891_s23 }
   0x8   : > { %p329_p4 = scmp.gt.s32.totalorder (!%p272_p2), %s894_s24, 0  ;;  %p895_p5 = scmp.lt.s32.totalorder (!%p272_p2), %s894_s24, 7 }
   0x9   : > { %p341_p6 = scmp.lt.s32.totalorder (!%p272_p2), %s340_s27, 7 }
   0xb   : > { %s1001_s25 = scalar_select %p322_p3, %s891_s23, 7 }
   0xc   : > { %s1217_s24 = smov (!%p329_p4, %s894_s24), 0  ;;  %s1221_s27 = smov (!%p341_p6, %s340_s27), 7 }
   0xd   : > { %s892_s26 = sshll.u32 %s1001_s25, 3  ;;  %s1219_s24 = smov (!%p895_p5, %s1217_s24), 7 }
   0xe   : > { %s1007_s30 = scalar_lea.vmem %s1209_s0, %s892_s26  ;;  %s900_s7 = sshll.u32 %s1219_s24, 3 }
   0xf   : > { %s354_s10 = scalar_lea.vmem %s1213_s4, %s1001_s25  ;;  %s1016_s13 = scalar_lea.vmem %s1210_s1, %s900_s7 }
  0x10   : > { %s1021_s16 = scalar_lea.vmem %s1214_s5, %s892_s26  ;;  %s1223_s27 = smov (!%p341_p6, %s1221_s27), 7 }
  0x11   : > { %s905_s17 = sshll.u32 %s1223_s27, 3  ;;  %366 = sbr.rel (%p909_p7) target bundleno = 24 (0x18), region = 44 }
  0x12   : > { %s346_s20 = scalar_lea.vmem %s1211_s2, %s905_s17 }
  0x16   : > { %vm367_vm0 = vcmask 15360   ;;  %v948_v0 = vmov 0.0  }
  0x17   : > { %368 = vst.msk [vmem:[%s1215_s6] sm:$0xff] %vm367_vm0, %v948_v0 }
  0x18 PF: > { %v373_v1 = vld [vmem:[%s1007_s30 + $0x18] sm:$0xff]  ;;  %v374_v2 = vld [vmem:[%s346_s20] sm:$0xff]  ;;  %v371_v3 = vld [vmem:[%s1007_s30 + $0x8] sm:$0xff]  ;;  %s949_s22 = smov 90   ;;  %s950_s26 = smov 92   ;;  %vm505_vm1 = vcmask 736256  }
  0x19   : > { %v377_v4 = vpack.c.bf16 %v374_v2, %v373_v1  ;;  %v372_v5 = vld [vmem:[%s1007_s30 + $0x10] sm:$0xff]  ;;  %v369_v15 = vld [vmem:[%s1016_s13] sm:$0xff]  ;;  %s951_s27 = smov 91   ;;  %s952_s28 = smov 109   ;;  %vm475_vm2 = vcmask 752640   ;;  %vm490_vm3 = vcmask 744448  }
  0x1a   : > { %v376_v6 = vpack.c.bf16 %v372_v5, %v371_v3  ;;  %v370_v16 = vld [vmem:[%s1007_s30] sm:$0xff]  ;;  %s953_s29 = smov 108   ;;  %s954_s30 = smov 126   ;;  %vm510_vm4 = vcmask 1043456   ;;  %vm444_vm5 = vcmask 891904   ;;  %vm460_vm6 = vcmask 883712  }
  0x1b   : > { %v385_v7 = vunpack.c.l.b16 %v377_v4  ;;  %v448_v11 = vunpack.c.h.b16 %v377_v4  ;;  %v375_v17 = vpack.c.bf16 %v370_v16, %v369_v15  ;;  %s955_s7 = smov 110   ;;  %s956_s8 = smov 127   ;;  %vm416_vm7 = vcmask 1031168  }
  0x1c   : > { %v383_v8 = vunpack.c.l.b16 %v376_v6  ;;  %v384_v12 = vunpack.c.h.b16 %v376_v6  ;;  %s957_s9 = smov 19   ;;  %vm431_vm8 = vcmask 900096   ;;  %vm401_vm9 = vcmask 1039360  }
  0x1d   : > { %v1032_v9 = vpack.c.b16 %v385_v7, %v385_v7  ;;  %v449_v13 = vpack.c.b16 %v448_v11, %v448_v11  ;;  %v382_v18 = vunpack.c.h.b16 %v375_v17  ;;  %v381_v20 = vunpack.c.l.b16 %v375_v17 }
  0x1e   : > { %v1034_v10 = vpack.c.b16 %v383_v8, %v383_v8  ;;  %v1039_v14 = vpack.c.b16 %v384_v12, %v384_v12  ;;  %vm642_vm10 = vcmask 154624   ;;  %vm679_vm11 = vcmask 588800  }
  0x1f   : > { %501 = vrot.lane.b32.xlu1 %v1032_v9, %s949_s22  ;;  %v1048_v19 = vpack.c.b16 %v382_v18, %v382_v18  ;;  %v1071_v21 = vpack.c.b16 %v381_v20, %v381_v20  ;;  %vm780_vm12 = vcmask 7168   ;;  %vm783_vm13 = vcmask 15360  }
  0x20   : > { %467 = vrot.lane.b32.xlu2 %v1034_v10, %s950_s26  ;;  %497 = vrot.lane.b32.xlu0 %v1034_v10, %s949_s22 }
  0x27   : > { %503 = vrot.lane.b32.xlu1 %v449_v13, %s949_s22 }
  0x28   : > { %469 = vrot.lane.b32.xlu2 %v1039_v14, %s950_s26  ;;  %499 = vrot.lane.b32.xlu0 %v1039_v14, %s949_s22 }
  0x2f   : > { %482 = vrot.lane.b32.xlu1 %v1034_v10, %s951_s27 }
  0x30   : > { %484 = vrot.lane.b32.xlu2 %v1039_v14, %s951_s27  ;;  %471 = vrot.lane.b32.xlu0 %v1032_v9, %s950_s26 }
  0x37   : > { %495 = vrot.lane.b32.xlu1 %v1048_v19, %s949_s22 }
  0x38   : > { %473 = vrot.lane.b32.xlu2 %v449_v13, %s950_s26  ;;  %486 = vrot.lane.b32.xlu0 %v1032_v9, %s951_s27 }
  0x3f   : > { %438 = vrot.lane.b32.xlu1 %v1034_v10, %s952_s28 }
  0x40   : > { %440 = vrot.lane.b32.xlu2 %v1039_v14, %s952_s28  ;;  %488 = vrot.lane.b32.xlu0 %v449_v13, %s951_s27 }
  0x47   : > { %452 = vrot.lane.b32.xlu1 %v1034_v10, %s953_s29 }
  0x48   : > { %454 = vrot.lane.b32.xlu2 %v1039_v14, %s953_s29  ;;  %442 = vrot.lane.b32.xlu0 %v1032_v9, %s952_s28 }
  0x4f   : > { %465 = vrot.lane.b32.xlu1 %v1048_v19, %s950_s26 }
  0x50   : > { %456 = vrot.lane.b32.xlu0 %v1032_v9, %s953_s29  ;;  %480 = vrot.lane.b32.xlu2 %v1048_v19, %s951_s27 }
  0x57   : > { %410 = vrot.lane.b32.xlu1 %v1034_v10, %s954_s30 }
  0x58   : > { %458 = vrot.lane.b32.xlu0 %v449_v13, %s953_s29  ;;  %412 = vrot.lane.b32.xlu2 %v1039_v14, %s954_s30 }
  0x5f   : > { %425 = vrot.lane.b32.xlu1 %v1034_v10, %s955_s7 }
  0x60   : > { %414 = vrot.lane.b32.xlu0 %v1032_v9, %s954_s30  ;;  %427 = vrot.lane.b32.xlu2 %v1039_v14, %s955_s7 }
  0x67   : > { %436 = vrot.lane.b32.xlu1 %v1048_v19, %s952_s28 }
  0x68   : > { %429 = vrot.lane.b32.xlu0 %v1032_v9, %s955_s7  ;;  %450 = vrot.lane.b32.xlu2 %v1048_v19, %s953_s29 }
  0x6f   : > { %397 = vrot.lane.b32.xlu1 %v1039_v14, %s956_s8 }
  0x70   : > { %395 = vrot.lane.b32.xlu0 %v1034_v10, %s956_s8  ;;  %399 = vrot.lane.b32.xlu2 %v1032_v9, %s956_s8 }
  0x77   : > { %408 = vrot.lane.b32.xlu1 %v1048_v19, %s954_s30 }
  0x78   : > { %406 = vrot.lane.b32.xlu0 %v1071_v21, %s954_s30  ;;  %421 = vrot.lane.b32.xlu2 %v1071_v21, %s955_s7 }
  0x7a   : > { %v468_v22 = vpop.permute.xlu2 %467 }
  0x7f   : > { %391 = vrot.lane.b32.xlu1 %v1071_v21, %s956_s8 }
  0x80   : > { %423 = vrot.lane.b32.xlu0 %v1048_v19, %s955_s7  ;;  %393 = vrot.lane.b32.xlu2 %v1048_v19, %s956_s8 }
  0x82   : > { %v470_v23 = vpop.permute.xlu2 %469 }
  0x83   : > { %v477_v33 = vsel %vm475_vm2, %v468_v22, %v470_v23 }
  0x8a   : > { %v485_v24 = vpop.permute.xlu2 %484 }
  0x91   : > { %v502_v25 = vpop.permute.xlu1 %501 }
  0x92   : > { %v498_v26 = vpop.permute.xlu0 %497  ;;  %v474_v30 = vpop.permute.xlu2 %473 }
  0x99   : > { %v504_v27 = vpop.permute.xlu1 %503 }
  0x9a   : > { %v500_v28 = vpop.permute.xlu0 %499  ;;  %v509_v29 = vsel %vm505_vm1, %v502_v25, %v504_v27  ;;  %v441_v37 = vpop.permute.xlu2 %440 }
  0x9b   : > { %v508_v31 = vsel %vm505_vm1, %v500_v28, %v502_v25  ;;  %640 = vrot.lane.b32.xlu2 %v509_v29, %s957_s9  ;;  %v507_v43 = vsel %vm505_vm1, %v498_v26, %v500_v28 }
  0x9c   : > { %638 = vrot.lane.b32.xlu1 %v508_v31, %s957_s9 }
  0xa1   : > { %v483_v32 = vpop.permute.xlu1 %482 }
  0xa2   : > { %v492_v34 = vsel %vm490_vm3, %v483_v32, %v485_v24  ;;  %v472_v35 = vpop.permute.xlu0 %471  ;;  %v455_v41 = vpop.permute.xlu2 %454 }
  0xa3   : > { %v564_v36 = vsel %vm510_vm4, %v477_v33, %v492_v34  ;;  %v479_v45 = vsel %vm475_vm2, %v472_v35, %v474_v30  ;;  %v478_v49 = vsel %vm475_vm2, %v470_v23, %v472_v35 }
  0xa4   : > { %626 = vrot.lane.b32.xlu2 %v564_v36, %s957_s9 }
  0xa9   : > { %v496_v38 = vpop.permute.xlu1 %495 }
  0xaa   : > { %v487_v39 = vpop.permute.xlu0 %486  ;;  %632 = vrot.lane.b32.xlu0 %v496_v38, %s957_s9  ;;  %v506_v40 = vsel %vm505_vm1, %v496_v38, %v498_v26  ;;  %v481_v51 = vpop.permute.xlu2 %480 }
  0xab   : > { %634 = vrot.lane.b32.xlu1 %v506_v40, %s957_s9  ;;  %v493_v48 = vsel %vm490_vm3, %v485_v24, %v487_v39  ;;  %v491_v58 = vsel %vm490_vm3, %v481_v51, %v483_v32 }
  0xac   : > { %v567_v53 = vsel %vm510_vm4, %v478_v49, %v493_v48 }
  0xb1   : > { %v439_v42 = vpop.permute.xlu1 %438 }
  0xb2   : > { %v489_v44 = vpop.permute.xlu0 %488  ;;  %636 = vrot.lane.b32.xlu0 %v507_v43, %s957_s9  ;;  %v446_v50 = vsel %vm444_vm5, %v439_v42, %v441_v37  ;;  %v413_v62 = vpop.permute.xlu2 %412 }
  0xb3   : > { %v494_v46 = vsel %vm490_vm3, %v487_v39, %v489_v44 }
  0xb4   : > { %v570_v47 = vsel %vm510_vm4, %v479_v45, %v494_v46 }
  0xb5   : > { %630 = vrot.lane.b32.xlu1 %v570_v47, %s957_s9 }
  0xb9   : > { %v453_v52 = vpop.permute.xlu1 %452 }
  0xba   : > { %v443_v54 = vpop.permute.xlu0 %442  ;;  %v462_v55 = vsel %vm460_vm6, %v453_v52, %v455_v41  ;;  %628 = vrot.lane.b32.xlu0 %v567_v53, %s957_s9  ;;  %v428_v7 = vpop.permute.xlu2 %427 }
  0xbb   : > { %v549_v56 = vsel %vm510_vm4, %v446_v50, %v462_v55  ;;  %v447_v63 = vsel %vm444_vm5, %v441_v37, %v443_v54 }
  0xbc   : > { %616 = vrot.lane.b32.xlu2 %v549_v56, %s957_s9 }
  0xc1   : > { %v466_v57 = vpop.permute.xlu1 %465 }
  0xc2   : > { %v457_v59 = vpop.permute.xlu0 %456  ;;  %v476_v60 = vsel %vm475_vm2, %v466_v57, %v468_v22  ;;  %v558_v61 = vsel %vm510_vm4, %v466_v57, %v481_v51  ;;  %v451_v16 = vpop.permute.xlu2 %450 }
  0xc3   : > { %v463_v0 = vsel %vm460_vm6, %v455_v41, %v457_v59  ;;  %622 = vrot.lane.b32.xlu1 %v558_v61, %s957_s9  ;;  %v561_v1 = vsel %vm510_vm4, %v476_v60, %v491_v58  ;;  %v461_v18 = vsel %vm460_vm6, %v451_v16, %v453_v52 }
  0xc4   : > { %624 = vrot.lane.b32.xlu2 %v561_v1, %s957_s9  ;;  %v552_v2 = vsel %vm510_vm4, %v447_v63, %v463_v0 }
  0xc5   : > { %618 = vrot.lane.b32.xlu0 %v552_v2, %s957_s9 }
  0xc9   : > { %v411_v3 = vpop.permute.xlu1 %410 }
  0xca   : > { %v459_v4 = vpop.permute.xlu0 %458  ;;  %v419_v8 = vsel %vm416_vm7, %v411_v3, %v413_v62  ;;  %v400_v28 = vpop.permute.xlu2 %399 }
  0xcb   : > { %v464_v5 = vsel %vm460_vm6, %v457_v59, %v459_v4  ;;  %v525_v36 = vsel %vm510_vm4, %v1032_v9, %v400_v28 }
  0xcc   : > { %v555_v6 = vsel %vm510_vm4, %v443_v54, %v464_v5 }
  0xcd   : > { %620 = vrot.lane.b32.xlu0 %v555_v6, %s957_s9 }
  0xd1   : > { %v426_v11 = vpop.permute.xlu1 %425 }
  0xd2   : > { %v415_v12 = vpop.permute.xlu0 %414  ;;  %v434_v13 = vsel %vm431_vm8, %v426_v11, %v428_v7  ;;  %v422_v38 = vpop.permute.xlu2 %421 }
  0xd3   : > { %v534_v15 = vsel %vm510_vm4, %v419_v8, %v434_v13  ;;  %v420_v24 = vsel %vm416_vm7, %v413_v62, %v415_v12 }
  0xd4   : > { %606 = vrot.lane.b32.xlu1 %v534_v15, %s957_s9 }
  0xd9   : > { %v437_v17 = vpop.permute.xlu1 %436 }
  0xda   : > { %v430_v20 = vpop.permute.xlu0 %429  ;;  %v445_v22 = vsel %vm444_vm5, %v437_v17, %v439_v42  ;;  %v543_v23 = vsel %vm510_vm4, %v437_v17, %v451_v16  ;;  %v394_v9 = vpop.permute.xlu2 %393 }
  0xdb   : > { %v435_v25 = vsel %vm431_vm8, %v428_v7, %v430_v20  ;;  %v546_v26 = vsel %vm510_vm4, %v445_v22, %v461_v18  ;;  %612 = vrot.lane.b32.xlu0 %v543_v23, %s957_s9  ;;  %v540_v34 = vsel %vm510_vm4, %v415_v12, %v430_v20 }
  0xdc   : > { %614 = vrot.lane.b32.xlu1 %v546_v26, %s957_s9  ;;  %v537_v27 = vsel %vm510_vm4, %v420_v24, %v435_v25 }
  0xdd   : > { %608 = vrot.lane.b32.xlu2 %v537_v27, %s957_s9 }
  0xe1   : > { %v398_v29 = vpop.permute.xlu1 %397 }
  0xe2   : > { %v396_v30 = vpop.permute.xlu0 %395  ;;  %v405_v31 = vsel %vm401_vm9, %v398_v29, %v400_v28  ;;  %v571_v28 = vld [vmem:[%s1212_s3] sm:$0xf] }
  0xe3   : > { %v404_v32 = vsel %vm401_vm9, %v396_v30, %v398_v29  ;;  %v522_v33 = vsel %vm510_vm4, %v1039_v14, %v405_v31  ;;  %v403_v47 = vsel %vm401_vm9, %v394_v9, %v396_v30 }
  0xe4   : > { %598 = vrot.lane.b32.xlu1 %v522_v33, %s957_s9  ;;  %v519_v35 = vsel %vm510_vm4, %v1034_v10, %v404_v32  ;;  %v516_v49 = vsel %vm510_vm4, %v1048_v19, %v403_v47 }
  0xe5   : > { %610 = vrot.lane.b32.xlu2 %v540_v34, %s957_s9  ;;  %596 = vrot.lane.b32.xlu0 %v519_v35, %s957_s9 }
  0xe9   : > { %v409_v39 = vpop.permute.xlu1 %408 }
  0xea   : > { %v407_v37 = vpop.permute.xlu0 %406  ;;  %v418_v40 = vsel %vm416_vm7, %v409_v39, %v411_v3 }
  0xeb   : > { %v417_v41 = vsel %vm416_vm7, %v407_v37, %v409_v39 }
  0xec   : > { %600 = vrot.lane.b32.xlu1 %v525_v36, %s957_s9 }
  0xf1   : > { %v392_v45 = vpop.permute.xlu1 %391 }
  0xf2   : > { %v424_v14 = vpop.permute.xlu0 %423  ;;  %v402_v46 = vsel %vm401_vm9, %v392_v45, %v394_v9 }
  0xf3   : > { %v432_v42 = vsel %vm431_vm8, %v422_v38, %v424_v14  ;;  %v433_v10 = vsel %vm431_vm8, %v424_v14, %v426_v11  ;;  %v513_v48 = vsel %vm510_vm4, %v1071_v21, %v402_v46 }
  0xf4   : > { %v531_v43 = vsel %vm510_vm4, %v418_v40, %v433_v10  ;;  %v528_v44 = vsel %vm510_vm4, %v417_v41, %v432_v42  ;;  %v751_v41 = vld [vmem:[%s354_s10] sm:$0xf] }
  0xf5   : > { %604 = vrot.lane.b32.xlu0 %v531_v43, %s957_s9  ;;  %602 = vrot.lane.b32.xlu2 %v528_v44, %s957_s9  ;;  %v641_v50 = vpop.permute.xlu2 %640  ;;  %v755_v42 = vperm.slane %v751_v41, 2  ;;  %v753_v10 = vperm.slane %v751_v41, 0  ;;  %v754_v43 = vperm.slane %v751_v41, 1  ;;  %v756_v45 = vperm.slane %v751_v41, 3 }
  0xfd   : > { %594 = vrot.lane.b32.xlu0 %v516_v49, %s957_s9  ;;  %592 = vrot.lane.b32.xlu2 %v513_v48, %s957_s9 }
  0xfe   : > { %v627_v54 = vpop.permute.xlu2 %626 }
 0x10e   : > { %v639_v51 = vpop.permute.xlu1 %638 }
 0x10f   : > { %v662_v52 = vsel %vm642_vm10, %v639_v51, %v641_v50 }
 0x110   : > { %v693_v53 = vsel %vm510_vm4, %v662_v52, 0 }
 0x111   : > { %737 = vmatpush.bf16.msra.mxu3 %v693_v53 }
 0x116   : > { %v617_v56 = vpop.permute.xlu2 %616 }
 0x11c   : > { %v633_v55 = vpop.permute.xlu0 %632 }
 0x11d   : > { %v635_v57 = vpop.permute.xlu1 %634 }
 0x11e   : > { %v659_v21 = vsel %vm642_vm10, %v633_v55, %v635_v57  ;;  %v625_v63 = vpop.permute.xlu2 %624 }
 0x11f   : > { %v684_v19 = vsel %vm510_vm4, %v659_v21, 0  ;;  %v656_v0 = vsel %vm642_vm10, %v625_v63, %v627_v54 }
 0x120   : > { %698 = vmatpush.bf16.msra.mxu0 %v684_v19 }
 0x124   : > { %v637_v58 = vpop.permute.xlu0 %636 }
 0x125   : > { %v660_v59 = vsel %vm642_vm10, %v635_v57, %v637_v58  ;;  %v661_v60 = vsel %vm642_vm10, %v637_v58, %v639_v51 }
 0x126   : > { %v687_v61 = vsel %vm510_vm4, %v660_v59, 0  ;;  %v690_v62 = vsel %vm510_vm4, %v661_v60, 0 }
 0x127   : > { %711 = vmatpush.bf16.msra.mxu1 %v687_v61  ;;  %724 = vmatpush.bf16.msra.mxu2 %v690_v62  ;;  %v631_v1 = vpop.permute.xlu1 %630  ;;  %v765_v61 = vld [vmem:[%s1215_s6] sm:$0xff] }
 0x12b   : > { %712 = vmatpush.bf16.msra.mxu1 %v656_v0 }
 0x12c   : > { %v629_v2 = vpop.permute.xlu0 %628 }
 0x12d   : > { %v657_v3 = vsel %vm642_vm10, %v627_v54, %v629_v2  ;;  %v658_v4 = vsel %vm642_vm10, %v629_v2, %v631_v1 }
 0x12e   : > { %725 = vmatpush.bf16.msra.mxu2 %v657_v3  ;;  %738 = vmatpush.bf16.msra.mxu3 %v658_v4 }
 0x135   : > { %v623_v5 = vpop.permute.xlu1 %622 }
 0x136   : > { %v655_v6 = vsel %vm642_vm10, %v623_v5, %v625_v63 }
 0x137   : > { %v609_v7 = vpop.permute.xlu2 %608  ;;  %v619_v8 = vpop.permute.xlu0 %618  ;;  %699 = vmatpush.bf16.msra.mxu0 %v655_v6 }
 0x138   : > { %v653_v11 = vsel %vm642_vm10, %v617_v56, %v619_v8 }
 0x139   : > { %726 = vmatpush.bf16.msra.mxu2 %v653_v11 }
 0x13f   : > { %v621_v12 = vpop.permute.xlu0 %620  ;;  %v611_v15 = vpop.permute.xlu2 %610 }
 0x140   : > { %v654_v13 = vsel %vm642_vm10, %v619_v8, %v621_v12  ;;  %v650_v16 = vsel %vm642_vm10, %v609_v7, %v611_v15 }
 0x141   : > { %739 = vmatpush.bf16.msra.mxu3 %v654_v13 }
 0x145   : > { %740 = vmatpush.bf16.msra.mxu3 %v650_v16 }
 0x146   : > { %v607_v17 = vpop.permute.xlu1 %606 }
 0x147   : > { %v649_v18 = vsel %vm642_vm10, %v607_v17, %v609_v7 }
 0x148   : > { %727 = vmatpush.bf16.msra.mxu2 %v649_v18 }
 0x14d   : > { %v613_v20 = vpop.permute.xlu0 %612 }
 0x14e   : > { %v615_v22 = vpop.permute.xlu1 %614 }
 0x14f   : > { %v651_v23 = vsel %vm642_vm10, %v613_v20, %v615_v22  ;;  %v652_v24 = vsel %vm642_vm10, %v615_v22, %v617_v56  ;;  %v603_v31 = vpop.permute.xlu2 %602 }
 0x150   : > { %700 = vmatpush.bf16.msra.mxu0 %v651_v23  ;;  %713 = vmatpush.bf16.msra.mxu1 %v652_v24 }
 0x156   : > { %v599_v25 = vpop.permute.xlu1 %598 }
 0x157   : > { %v597_v26 = vpop.permute.xlu0 %596  ;;  %v593_v35 = vpop.permute.xlu2 %592 }
 0x158   : > { %v645_v27 = vsel %vm642_vm10, %v597_v26, %v599_v25 }
 0x159   : > { %728 = vmatpush.bf16.msra.mxu2 %v645_v27 }
 0x15c   : > { %912 = vmatmul.msk.bf16.vlgmr.msra.gmra.mxu2 %vm679_vm11, %v571_v28 }
 0x15e   : > { %v601_v29 = vpop.permute.xlu1 %600 }
 0x15f   : > { %v646_v30 = vsel %vm642_vm10, %v599_v25, %v601_v29 }
 0x160   : > { %741 = vmatpush.bf16.msra.mxu3 %v646_v30 }
 0x163   : > { %913 = vmatmul.msk.bf16.vlgmr.msra.gmra.mxu3 %vm679_vm11, %v571_v28 }
 0x167   : > { %v605_v32 = vpop.permute.xlu0 %604 }
 0x168   : > { %v647_v33 = vsel %vm642_vm10, %v603_v31, %v605_v32  ;;  %v648_v34 = vsel %vm642_vm10, %v605_v32, %v607_v17 }
 0x169   : > { %701 = vmatpush.bf16.msra.mxu0 %v647_v33  ;;  %714 = vmatpush.bf16.msra.mxu1 %v648_v34 }
 0x16f   : > { %v595_v36 = vpop.permute.xlu0 %594 }
 0x170   : > { %v643_v37 = vsel %vm642_vm10, %v593_v35, %v595_v36  ;;  %v644_v38 = vsel %vm642_vm10, %v595_v36, %v597_v26 }
 0x171   : > { %702 = vmatpush.bf16.msra.mxu0 %v643_v37  ;;  %715 = vmatpush.bf16.msra.mxu1 %v644_v38 }
 0x174   : > { %910 = vmatmul.msk.bf16.vlgmr.msra.gmra.mxu0 %vm679_vm11, %v571_v28  ;;  %911 = vmatmul.msk.bf16.vlgmr.msra.gmra.mxu1 %vm679_vm11, %v571_v28 }
 0x1df   : > { %v730_v39 = vpop.f32.mrf.mxu2 }
 0x1e0   : > { %v763_v47 = vmul.f32 %v755_v42, %v730_v39  ;;  %749 = vst [vmem:[%s1021_s16 + $0x10] sm:$0xff] %v730_v39 }
 0x1e2   : > { %v773_v54 = vmul.f32 %v763_v47, %v730_v39 }
 0x1e6   : > { %v743_v14 = vpop.f32.mrf.mxu3 }
 0x1e7   : > { %v732_v40 = vpop.f32.mrf.mxu2  ;;  %v764_v52 = vmul.f32 %v756_v45, %v743_v14  ;;  %750 = vst [vmem:[%s1021_s16 + $0x18] sm:$0xff] %v743_v14 }
 0x1e9   : > { %v774_v21 = vmul.f32 %v764_v52, %v743_v14 }
 0x1ee   : > { %v745_v44 = vpop.f32.mrf.mxu3 }
 0x1f1   : > { %v704_v9 = vpop.f32.mrf.mxu0  ;;  %v717_v46 = vpop.f32.mrf.mxu1 }
 0x1f2   : > { %747 = vst [vmem:[%s1021_s16] sm:$0xff] %v704_v9  ;;  %v761_v48 = vmul.f32 %v753_v10, %v704_v9  ;;  %v762_v49 = vmul.f32 %v754_v43, %v717_v46 }
 0x1f3   : > { %748 = vst [vmem:[%s1021_s16 + $0x8] sm:$0xff] %v717_v46 }
 0x1f4   : > { %v771_v50 = vmul.f32 %v761_v48, %v704_v9  ;;  %v772_v51 = vmul.f32 %v762_v49, %v717_v46  ;;  %v766_v53 = vadd.f32 %v762_v49, %v761_v48 }
 0x1f6   : > { %v767_v55 = vadd.f32 %v766_v53, %v763_v47  ;;  %v775_v56 = vadd.f32 %v772_v51, %v771_v50 }
 0x1f8   : > { %v768_v57 = vadd.f32 %v767_v55, %v764_v52  ;;  %v776_v19 = vadd.f32 %v775_v56, %v773_v54 }
 0x1f9   : > { %v706_v58 = vpop.f32.mrf.mxu0  ;;  %v719_v59 = vpop.f32.mrf.mxu1 }
 0x1fa   : > { %769 = vadd.xlane.f32.xlu1 %v768_v57  ;;  %v777_v60 = vadd.f32 %v776_v19, %v774_v21 }
 0x1fc   : > { %778 = vadd.xlane.f32.xlu2 %v777_v60 }
 0x26d   : > { %v770_v62 = vpop.xlane.xlu1 %769 }
 0x26f   : > { %v779_v63 = vpop.xlane.xlu2 %778 }
 0x270   : > { %v781_v0 = vsel %vm780_vm12, %v770_v62, %v779_v63 }
 0x271   : > { %v782_v1 = vadd.f32 %v781_v0, %v765_v61 }
 0x273   : > { %784 = vst.msk [vmem:[%s1215_s6] sm:$0xff] %vm783_vm13, %v782_v1 }
 0x274 PF: > { %s17_s21 = sadd.s32 1, %s946_s21  }
 0x275   : > { %p14_p8 = scmp.ge.s32.totalorder %s17_s21, 4  }
 0x277   :  { %16 = sbr.rel (!%p14_p8) target bundleno = 1 (0x1), region = 91 }

// kernel: up_res_layer_pallas.6
= control target key start
LH: loop header
LB: loop body
LE: loop exit
PB: predicated region body
PF: predicated region fallthrough
CT: control target
= control target key end

     0   :  { %s982_s21 = smov 0   ;;  %s1205_s0 = inlined_call_operand.vmem [shape: f32[4,1024], index: 0, kind: input, shape index: {}, may-alias: {0,1,2}]   ;;  %s1206_s1 = inlined_call_operand.vmem [shape: f32[4,1024], index: 1, kind: input, shape index: {}, may-alias: {0,1,2}]   ;;  %s1207_s2 = inlined_call_operand.vmem [shape: f32[4,1024], index: 2, kind: input, shape index: {}, may-alias: {0,1,2}]   ;;  %s1208_s3 = inlined_call_operand.vmem [shape: bf16[8,36], index: 3, kind: input, shape index: {}]   ;;  %s1209_s4 = inlined_call_operand.vmem [shape: f32[1,1024], index: 4, kind: input, shape index: {}]   ;;  %s1210_s5 = inlined_call_operand.vmem [shape: f32[8,1024], index: 5, kind: output, shape index: {0}]   ;;  %s1211_s6 = inlined_call_operand.vmem [shape: f32[8,2], index: 6, kind: output, shape index: {1}]  }
   0x1 LB: > { %s869_s22 = sadd.s32 4294967295, %s935_s21   ;;  %p879_p0 = scmp.ge.s32.totalorder %s935_s21, 1  ;;  %s935_s21 = sphi %s982_s21, %s17_s21  }
   0x2   : > { %p271_p1 = scmp.lt.s32.totalorder %s935_s21, 3 }
   0x4   : > { %p272_p2 = pnand %p879_p0, %p271_p1 }
   0x5   : > { %s880_s23 = sshll.u32 (!%p272_p2), %s869_s22, 2  ;;  %p898_p7 = scmp.ne.s32.totalorder (!%p272_p2), %s869_s22, 0 }
   0x6   : > { %275 = sbr.rel (%p272_p2) target bundleno = 630 (0x276), region = 40  ;;  %p322_p3 = scmp.lt.s32.totalorder (!%p272_p2), %s880_s23, 7 }
   0x7   : > { %s883_s24 = sadd.s32 (!%p272_p2), 4294967295, %s880_s23  ;;  %s340_s27 = sadd.s32 (!%p272_p2), 4, %s880_s23 }
   0x8   : > { %p329_p4 = scmp.gt.s32.totalorder (!%p272_p2), %s883_s24, 0  ;;  %p884_p5 = scmp.lt.s32.totalorder (!%p272_p2), %s883_s24, 7 }
   0x9   : > { %p341_p6 = scmp.lt.s32.totalorder (!%p272_p2), %s340_s27, 7 }
   0xb   : > { %s990_s25 = scalar_select %p322_p3, %s880_s23, 7 }
   0xc   : > { %s1213_s24 = smov (!%p329_p4, %s883_s24), 0  ;;  %s1217_s27 = smov (!%p341_p6, %s340_s27), 7 }
   0xd   : > { %s881_s26 = sshll.u32 %s990_s25, 2  ;;  %s1215_s24 = smov (!%p884_p5, %s1213_s24), 7 }
   0xe   : > { %s325_s30 = scalar_lea.vmem %s1205_s0, %s881_s26  ;;  %s889_s7 = sshll.u32 %s1215_s24, 2 }
   0xf   : > { %s354_s10 = scalar_lea.vmem %s1209_s4, %s990_s25  ;;  %s1003_s13 = scalar_lea.vmem %s1206_s1, %s889_s7 }
  0x10   : > { %s897_s14 = sshll.u32 %s990_s25, 3  ;;  %s1219_s27 = smov (!%p341_p6, %s1217_s27), 7 }
  0x11   : > { %s1009_s17 = scalar_lea.vmem %s1210_s5, %s897_s14  ;;  %s894_s18 = sshll.u32 %s1219_s27, 2 }
  0x12   : > { %s346_s23 = scalar_lea.vmem %s1207_s2, %s894_s18  ;;  %366 = sbr.rel (%p898_p7) target bundleno = 25 (0x19), region = 44 }
  0x17   : > { %vm367_vm0 = vcmask 15360   ;;  %v937_v0 = vmov 0.0  }
  0x18   : > { %368 = vst.msk [vmem:[%s1211_s6] sm:$0xff] %vm367_vm0, %v937_v0 }
  0x19 PF: > { %v371_v1 = vld [vmem:[%s325_s30 + $0x8] sm:$0xff]  ;;  %v370_v2 = vld [vmem:[%s325_s30] sm:$0xff]  ;;  %s938_s22 = smov 90   ;;  %s939_s27 = smov 109   ;;  %vm528_vm1 = vcmask 736256   ;;  %vm482_vm2 = vcmask 883712  }
  0x1a   : > { %377 = vst [vmem:[#allocation1 + $0x10] ss:$2 sm:$0xff] %v371_v1  ;;  %v372_v3 = vld [vmem:[%s346_s23] sm:$0xf]  ;;  %s940_s28 = smov 108   ;;  %s941_s29 = smov 92  }
  0x1b   : > { %375 = vst [vmem:[#allocation1] ss:$2 sm:$0xff] %v370_v2  ;;  %v369_v20 = vld [vmem:[%s1003_s13] sm:$0xf]  ;;  %s942_s30 = smov 91   ;;  %s943_s7 = smov 127  }
  0x1c   : > { %s944_s8 = smov 126   ;;  %s945_s9 = smov 110   ;;  %vm533_vm3 = vcmask 1041408   ;;  %vm497_vm4 = vcmask 752640   ;;  %vm465_vm5 = vcmask 891904   ;;  %vm513_vm6 = vcmask 744448  }
  0x1d   : > { %s946_s11 = smov 19   ;;  %vm549_vm7 = vcmask 1043456   ;;  %vm560_vm8 = vcmask 1045504   ;;  %vm417_vm9 = vcmask 1039360   ;;  %vm432_vm10 = vcmask 1031168  }
  0x1e   : > { %vm452_vm11 = vcmask 900096   ;;  %vm647_vm12 = vcmask 154624   ;;  %vm668_vm13 = vcmask 293888   ;;  %vm769_vm14 = vcmask 7168  }
  0x1f   : > { %vm772_vm15 = vcmask 15360  }
  0x21   : > { %v381_v4 = vld.sshfl [vmem:[#allocation1 + $0x18] sm:$0xff pattern:$0x75316420]  ;;  %v380_v5 = vld.sshfl [vmem:[#allocation1 + $0x10] sm:$0xff pattern:$0x75316420] }
  0x22   : > { %v388_v6 = vpack.c.bf16 %v372_v3, %v381_v4  ;;  %v379_v7 = vld.sshfl [vmem:[#allocation1 + $0x8] sm:$0xff pattern:$0x75316420]  ;;  %v378_v21 = vld.sshfl [vmem:[#allocation1] sm:$0xff pattern:$0x75316420] }
  0x23   : > { %v387_v8 = vpack.c.bf16 %v380_v5, %v379_v7  ;;  %v386_v24 = vpack.c.bf16 %v378_v21, %v369_v20 }
  0x24   : > { %v396_v9 = vunpack.c.l.b16 %v388_v6  ;;  %v469_v18 = vunpack.c.h.b16 %v388_v6 }
  0x25   : > { %v395_v10 = vunpack.c.h.b16 %v387_v8  ;;  %v394_v11 = vunpack.c.l.b16 %v387_v8  ;;  %v393_v25 = vunpack.c.h.b16 %v386_v24  ;;  %v392_v32 = vunpack.c.l.b16 %v386_v24 }
  0x26   : > { %v1017_v12 = vpack.c.b16 %v396_v9, %v396_v9  ;;  %v470_v19 = vpack.c.b16 %v469_v18, %v469_v18 }
  0x27   : > { %v1019_v13 = vpack.c.b16 %v395_v10, %v395_v10  ;;  %v1021_v14 = vpack.c.b16 %v394_v11, %v394_v11  ;;  %v1054_v28 = vpack.c.b16 %v393_v25, %v393_v25  ;;  %v1073_v33 = vpack.c.b16 %v392_v32, %v392_v32 }
  0x28   : > { %524 = vrot.lane.b32.xlu1 %v1017_v12, %s938_s22  ;;  %v406_v16 = vrot.slane %v1017_v12, 6  ;;  %v471_v22 = vrot.slane %v470_v19, 6  ;;  %v441_v26 = vrot.slane %v1017_v12, 2  ;;  %v502_v30 = vrot.slane %v470_v19, 2 }
  0x29   : > { %461 = vrot.lane.b32.xlu2 %v1019_v13, %s939_s27  ;;  %520 = vrot.lane.b32.xlu0 %v1021_v14, %s938_s22  ;;  %v405_v15 = vrot.slane %v1019_v13, 6  ;;  %v404_v17 = vrot.slane %v1021_v14, 6  ;;  %v439_v23 = vrot.slane %v1021_v14, 2  ;;  %v440_v27 = vrot.slane %v1019_v13, 2 }
  0x2a   : > { %v403_v29 = vrot.slane %v1054_v28, 6  ;;  %v438_v31 = vrot.slane %v1054_v28, 2  ;;  %v402_v34 = vrot.slane %v1073_v33, 6  ;;  %v437_v36 = vrot.slane %v1073_v33, 2 }
  0x30   : > { %459 = vrot.lane.b32.xlu1 %v1021_v14, %s939_s27 }
  0x31   : > { %463 = vrot.lane.b32.xlu2 %v1017_v12, %s939_s27  ;;  %522 = vrot.lane.b32.xlu0 %v1019_v13, %s938_s22 }
  0x38   : > { %476 = vrot.lane.b32.xlu1 %v405_v15, %s940_s28 }
  0x39   : > { %478 = vrot.lane.b32.xlu2 %v406_v16, %s940_s28  ;;  %474 = vrot.lane.b32.xlu0 %v404_v17, %s940_s28 }
  0x40   : > { %489 = vrot.lane.b32.xlu1 %v1021_v14, %s941_s29 }
  0x41   : > { %491 = vrot.lane.b32.xlu2 %v1019_v13, %s941_s29  ;;  %526 = vrot.lane.b32.xlu0 %v470_v19, %s938_s22 }
  0x48   : > { %480 = vrot.lane.b32.xlu1 %v471_v22, %s940_s28 }
  0x49   : > { %505 = vrot.lane.b32.xlu2 %v439_v23, %s942_s30  ;;  %493 = vrot.lane.b32.xlu0 %v1017_v12, %s941_s29 }
  0x50   : > { %509 = vrot.lane.b32.xlu1 %v441_v26, %s942_s30 }
  0x51   : > { %507 = vrot.lane.b32.xlu0 %v440_v27, %s942_s30  ;;  %518 = vrot.lane.b32.xlu2 %v1054_v28, %s938_s22 }
  0x58   : > { %411 = vrot.lane.b32.xlu1 %v404_v17, %s943_s7 }
  0x59   : > { %495 = vrot.lane.b32.xlu0 %v470_v19, %s941_s29  ;;  %413 = vrot.lane.b32.xlu2 %v405_v15, %s943_s7 }
  0x60   : > { %457 = vrot.lane.b32.xlu1 %v1054_v28, %s939_s27 }
  0x61   : > { %415 = vrot.lane.b32.xlu0 %v406_v16, %s943_s7  ;;  %472 = vrot.lane.b32.xlu2 %v403_v29, %s940_s28 }
  0x68   : > { %426 = vrot.lane.b32.xlu1 %v1021_v14, %s944_s8 }
  0x69   : > { %511 = vrot.lane.b32.xlu0 %v502_v30, %s942_s30  ;;  %428 = vrot.lane.b32.xlu2 %v1019_v13, %s944_s8 }
  0x70   : > { %487 = vrot.lane.b32.xlu1 %v1054_v28, %s941_s29 }
  0x71   : > { %430 = vrot.lane.b32.xlu0 %v1017_v12, %s944_s8  ;;  %446 = vrot.lane.b32.xlu2 %v439_v23, %s945_s9 }
  0x78   : > { %450 = vrot.lane.b32.xlu1 %v441_v26, %s945_s9 }
  0x79   : > { %448 = vrot.lane.b32.xlu0 %v440_v27, %s945_s9  ;;  %503 = vrot.lane.b32.xlu2 %v438_v31, %s942_s30 }
  0x80   : > { %409 = vrot.lane.b32.xlu1 %v403_v29, %s943_s7 }
  0x81   : > { %407 = vrot.lane.b32.xlu0 %v402_v34, %s943_s7  ;;  %422 = vrot.lane.b32.xlu2 %v1073_v33, %s944_s8 }
  0x83   : > { %v462_v35 = vpop.permute.xlu2 %461 }
  0x88   : > { %442 = vrot.lane.b32.xlu1 %v437_v36, %s945_s9 }
  0x89   : > { %424 = vrot.lane.b32.xlu0 %v1054_v28, %s944_s8  ;;  %444 = vrot.lane.b32.xlu2 %v438_v31, %s945_s9 }
  0x8b   : > { %v464_v37 = vpop.permute.xlu2 %463 }
  0x8c   : > { %v468_v63 = vsel %vm465_vm5, %v462_v35, %v464_v37 }
  0x93   : > { %v479_v38 = vpop.permute.xlu2 %478 }
  0x9a   : > { %v525_v39 = vpop.permute.xlu1 %524 }
  0x9b   : > { %v492_v40 = vpop.permute.xlu2 %491  ;;  %v521_v41 = vpop.permute.xlu0 %520 }
  0xa2   : > { %v460_v42 = vpop.permute.xlu1 %459 }
  0xa3   : > { %v523_v43 = vpop.permute.xlu0 %522  ;;  %v1079_v44 = vpop.permute.xlu2 %505  ;;  %v467_v0 = vsel %vm465_vm5, %v460_v42, %v462_v35 }
  0xa4   : > { %v531_v45 = vsel %vm528_vm1, %v523_v43, %v525_v39  ;;  %v530_v52 = vsel %vm528_vm1, %v521_v41, %v523_v43 }
  0xa5   : > { %643 = vrot.lane.b32.xlu1 %v531_v45, %s946_s11 }
  0xaa   : > { %v477_v46 = vpop.permute.xlu1 %476 }
  0xab   : > { %v475_v47 = vpop.permute.xlu0 %474  ;;  %v519_v48 = vpop.permute.xlu2 %518  ;;  %v485_v59 = vsel %vm482_vm2, %v477_v46, %v479_v38 }
  0xac   : > { %637 = vrot.lane.b32.xlu0 %v519_v48, %s946_s11  ;;  %v529_v49 = vsel %vm528_vm1, %v519_v48, %v521_v41  ;;  %v484_v60 = vsel %vm482_vm2, %v475_v47, %v477_v46  ;;  %v582_v2 = vsel %vm533_vm3, %v468_v63, %v485_v59 }
  0xad   : > { %639 = vrot.lane.b32.xlu1 %v529_v49, %s946_s11  ;;  %v579_v3 = vsel %vm533_vm3, %v467_v0, %v484_v60 }
  0xb2   : > { %v490_v50 = vpop.permute.xlu1 %489 }
  0xb3   : > { %v527_v51 = vpop.permute.xlu0 %526  ;;  %v414_v54 = vpop.permute.xlu2 %413  ;;  %v499_v61 = vsel %vm497_vm4, %v490_v50, %v492_v40 }
  0xb4   : > { %641 = vrot.lane.b32.xlu0 %v530_v52, %s946_s11  ;;  %v532_v53 = vsel %vm528_vm1, %v525_v39, %v527_v51  ;;  %v591_v8 = vsel %vm549_vm7, %v579_v3, %v499_v61 }
  0xb5   : > { %645 = vrot.lane.b32.xlu2 %v532_v53, %s946_s11 }
  0xba   : > { %v481_v55 = vpop.permute.xlu1 %480 }
  0xbb   : > { %v486_v56 = vsel %vm482_vm2, %v479_v38, %v481_v55  ;;  %v494_v57 = vpop.permute.xlu0 %493  ;;  %v473_v5 = vpop.permute.xlu2 %472 }
  0xbc   : > { %v585_v58 = vsel %vm533_vm3, %v464_v37, %v486_v56  ;;  %v500_v62 = vsel %vm497_vm4, %v492_v40, %v494_v57  ;;  %v483_v19 = vsel %vm482_vm2, %v473_v5, %v475_v47 }
  0xbd   : > { %v593_v9 = vsel %vm549_vm7, %v582_v2, %v500_v62 }
  0xc2   : > { %v510_v1 = vpop.permute.xlu1 %509 }
  0xc3   : > { %v508_v4 = vpop.permute.xlu0 %507  ;;  %v429_v17 = vpop.permute.xlu2 %428 }
  0xc4   : > { %v515_v6 = vsel %vm513_vm6, %v1079_v44, %v508_v4  ;;  %v516_v7 = vsel %vm513_vm6, %v508_v4, %v510_v1 }
  0xc5   : > { %v601_v10 = vsel %vm560_vm8, %v591_v8, %v515_v6  ;;  %v603_v11 = vsel %vm560_vm8, %v593_v9, %v516_v7 }
  0xc6   : > { %631 = vrot.lane.b32.xlu2 %v601_v10, %s946_s11  ;;  %633 = vrot.lane.b32.xlu0 %v603_v11, %s946_s11 }
  0xca   : > { %v412_v15 = vpop.permute.xlu1 %411 }
  0xcb   : > { %v496_v16 = vpop.permute.xlu0 %495  ;;  %v447_v23 = vpop.permute.xlu2 %446  ;;  %v420_v38 = vsel %vm417_vm9, %v412_v15, %v414_v54 }
  0xcc   : > { %v501_v39 = vsel %vm497_vm4, %v494_v57, %v496_v16 }
  0xcd   : > { %v595_v49 = vsel %vm549_vm7, %v585_v58, %v501_v39 }
  0xd2   : > { %v458_v18 = vpop.permute.xlu1 %457 }
  0xd3   : > { %v416_v20 = vpop.permute.xlu0 %415  ;;  %v466_v21 = vsel %vm465_vm5, %v458_v18, %v460_v42  ;;  %v573_v26 = vsel %vm533_vm3, %v458_v18, %v473_v5  ;;  %v504_v27 = vpop.permute.xlu2 %503 }
  0xd4   : > { %v576_v22 = vsel %vm533_vm3, %v466_v21, %v483_v19  ;;  %v514_v35 = vsel %vm513_vm6, %v504_v27, %v1079_v44  ;;  %v421_v40 = vsel %vm417_vm9, %v414_v54, %v416_v20  ;;  %v542_v44 = vsel %vm533_vm3, %v1021_v14, %v420_v38 }
  0xd5   : > { %v545_v46 = vsel %vm533_vm3, %v1019_v13, %v421_v40  ;;  %v548_v56 = vsel %vm533_vm3, %v1017_v12, %v416_v20 }
  0xda   : > { %v427_v24 = vpop.permute.xlu1 %426 }
  0xdb   : > { %v512_v25 = vpop.permute.xlu0 %511  ;;  %v435_v41 = vsel %vm432_vm10, %v427_v24, %v429_v17  ;;  %v423_v54 = vpop.permute.xlu2 %422 }
  0xdc   : > { %v517_v42 = vsel %vm513_vm6, %v510_v1, %v512_v25  ;;  %v555_v48 = vsel %vm549_vm7, %v542_v44, %v435_v41 }
  0xdd   : > { %v605_v52 = vsel %vm560_vm8, %v595_v49, %v517_v42 }
  0xe2   : > { %v488_v29 = vpop.permute.xlu1 %487 }
  0xe3   : > { %v431_v30 = vpop.permute.xlu0 %430  ;;  %v498_v31 = vsel %vm497_vm4, %v488_v29, %v490_v50  ;;  %v587_v32 = vsel %vm549_vm7, %v573_v26, %v488_v29  ;;  %v445_v62 = vpop.permute.xlu2 %444 }
  0xe4   : > { %v597_v34 = vsel %vm560_vm8, %v587_v32, %v504_v27  ;;  %v589_v36 = vsel %vm549_vm7, %v576_v22, %v498_v31  ;;  %v436_v43 = vsel %vm432_vm10, %v429_v17, %v431_v30  ;;  %v559_v58 = vsel %vm549_vm7, %v548_v56, %v431_v30 }
  0xe5   : > { %627 = vrot.lane.b32.xlu1 %v597_v34, %s946_s11  ;;  %v599_v37 = vsel %vm560_vm8, %v589_v36, %v514_v35  ;;  %v557_v53 = vsel %vm549_vm7, %v545_v46, %v436_v43  ;;  %v454_v5 = vsel %vm452_vm11, %v445_v62, %v447_v23  ;;  %v606_v36 = vld [vmem:[%s1208_s3] sm:$0xf] }
  0xea   : > { %v451_v45 = vpop.permute.xlu1 %450 }
  0xeb   : > { %v449_v47 = vpop.permute.xlu0 %448  ;;  %v570_v59 = vsel %vm560_vm8, %v559_v58, %v451_v45 }
  0xec   : > { %v455_v50 = vsel %vm452_vm11, %v447_v23, %v449_v47  ;;  %v456_v51 = vsel %vm452_vm11, %v449_v47, %v451_v45 }
  0xed   : > { %v566_v14 = vsel %vm560_vm8, %v555_v48, %v455_v50  ;;  %635 = vrot.lane.b32.xlu1 %v605_v52, %s946_s11  ;;  %v568_v13 = vsel %vm560_vm8, %v557_v53, %v456_v51  ;;  %v740_v48 = vld [vmem:[%s354_s10] sm:$0xf] }
  0xee   : > { %621 = vrot.lane.b32.xlu2 %v566_v14, %s946_s11  ;;  %623 = vrot.lane.b32.xlu0 %v568_v13, %s946_s11  ;;  %v743_v49 = vperm.slane %v740_v48, 1  ;;  %v744_v50 = vperm.slane %v740_v48, 2  ;;  %v742_v52 = vperm.slane %v740_v48, 0  ;;  %v745_v13 = vperm.slane %v740_v48, 3 }
  0xf2   : > { %v410_v55 = vpop.permute.xlu1 %409 }
  0xf3   : > { %v408_v57 = vpop.permute.xlu0 %407  ;;  %v419_v60 = vsel %vm417_vm9, %v410_v55, %v412_v15 }
  0xf4   : > { %v418_v61 = vsel %vm417_vm9, %v408_v57, %v410_v55  ;;  %v539_v12 = vsel %vm533_vm3, %v1054_v28, %v419_v60 }
  0xf5   : > { %v536_v2 = vsel %vm533_vm3, %v1073_v33, %v418_v61 }
  0xf6   : > { %629 = vrot.lane.b32.xlu2 %v599_v37, %s946_s11  ;;  %625 = vrot.lane.b32.xlu0 %v570_v59, %s946_s11 }
  0xfa   : > { %v443_v63 = vpop.permute.xlu1 %442 }
  0xfb   : > { %v425_v0 = vpop.permute.xlu0 %424  ;;  %v453_v1 = vsel %vm452_vm11, %v443_v63, %v445_v62 }
  0xfc   : > { %v433_v3 = vsel %vm432_vm10, %v423_v54, %v425_v0  ;;  %v434_v4 = vsel %vm432_vm10, %v425_v0, %v427_v24 }
  0xfd   : > { %v553_v6 = vsel %vm549_vm7, %v539_v12, %v434_v4  ;;  %v551_v7 = vsel %vm549_vm7, %v536_v2, %v433_v3 }
  0xfe   : > { %v564_v8 = vsel %vm560_vm8, %v553_v6, %v454_v5  ;;  %v562_v9 = vsel %vm560_vm8, %v551_v7, %v453_v1  ;;  %v754_v5 = vld [vmem:[%s1211_s6] sm:$0xff] }
  0xff   : > { %619 = vrot.lane.b32.xlu2 %v564_v8, %s946_s11  ;;  %617 = vrot.lane.b32.xlu1 %v562_v9, %s946_s11 }
 0x10f   : > { %v646_v28 = vpop.permute.xlu2 %645 }
 0x117   : > { %v644_v33 = vpop.permute.xlu1 %643 }
 0x118   : > { %v659_v10 = vsel %vm647_vm12, %v644_v33, %v646_v28 }
 0x119   : > { %v682_v11 = vsel %vm533_vm3, %v659_v10, 0 }
 0x11a   : > { %728 = vmatpush.bf16.msra.mxu3 %v682_v11 }
 0x11e   : > { %v638_v15 = vpop.permute.xlu0 %637 }
 0x11f   : > { %v640_v16 = vpop.permute.xlu1 %639 }
 0x120   : > { %v656_v17 = vsel %vm647_vm12, %v638_v15, %v640_v16  ;;  %v632_v24 = vpop.permute.xlu2 %631 }
 0x121   : > { %v673_v18 = vsel %vm533_vm3, %v656_v17, 0 }
 0x122   : > { %689 = vmatpush.bf16.msra.mxu0 %v673_v18 }
 0x126   : > { %v642_v19 = vpop.permute.xlu0 %641 }
 0x127   : > { %v657_v20 = vsel %vm647_vm12, %v640_v16, %v642_v19  ;;  %v658_v21 = vsel %vm647_vm12, %v642_v19, %v644_v33 }
 0x128   : > { %v676_v22 = vsel %vm533_vm3, %v657_v20, 0  ;;  %v679_v23 = vsel %vm533_vm3, %v658_v21, 0 }
 0x129   : > { %702 = vmatpush.bf16.msra.mxu1 %v676_v22  ;;  %715 = vmatpush.bf16.msra.mxu2 %v679_v23 }
 0x138   : > { %v634_v25 = vpop.permute.xlu0 %633 }
 0x139   : > { %v654_v26 = vsel %vm647_vm12, %v632_v24, %v634_v25 }
 0x13a   : > { %716 = vmatpush.bf16.msra.mxu2 %v654_v26 }
 0x148   : > { %v622_v27 = vpop.permute.xlu2 %621 }
 0x150   : > { %v630_v29 = vpop.permute.xlu2 %629 }
 0x151   : > { %v653_v30 = vsel %vm647_vm12, %v630_v29, %v632_v24 }
 0x152   : > { %703 = vmatpush.bf16.msra.mxu1 %v653_v30 }
 0x157   : > { %v628_v31 = vpop.permute.xlu1 %627 }
 0x158   : > { %v652_v32 = vsel %vm647_vm12, %v628_v31, %v630_v29 }
 0x159   : > { %v620_v34 = vpop.permute.xlu2 %619  ;;  %690 = vmatpush.bf16.msra.mxu0 %v652_v32 }
 0x15a   : > { %v649_v35 = vsel %vm647_vm12, %v620_v34, %v622_v27 }
 0x15b   : > { %704 = vmatpush.bf16.msra.mxu1 %v649_v35 }
 0x15e   : > { %900 = vmatmul.msk.bf16.vlgmr.msra.gmra.mxu1 %vm668_vm13, %v606_v36 }
 0x15f   : > { %v636_v37 = vpop.permute.xlu1 %635 }
 0x160   : > { %v624_v38 = vpop.permute.xlu0 %623  ;;  %v655_v39 = vsel %vm647_vm12, %v634_v25, %v636_v37 }
 0x161   : > { %v650_v40 = vsel %vm647_vm12, %v622_v27, %v624_v38  ;;  %729 = vmatpush.bf16.msra.mxu3 %v655_v39 }
 0x162   : > { %717 = vmatpush.bf16.msra.mxu2 %v650_v40 }
 0x165   : > { %901 = vmatmul.msk.bf16.vlgmr.msra.gmra.mxu2 %vm668_vm13, %v606_v36 }
 0x168   : > { %v626_v41 = vpop.permute.xlu0 %625 }
 0x169   : > { %v651_v42 = vsel %vm647_vm12, %v624_v38, %v626_v41 }
 0x16a   : > { %730 = vmatpush.bf16.msra.mxu3 %v651_v42 }
 0x16d   : > { %902 = vmatmul.msk.bf16.vlgmr.msra.gmra.mxu3 %vm668_vm13, %v606_v36 }
 0x171   : > { %v618_v43 = vpop.permute.xlu1 %617 }
 0x172   : > { %v648_v44 = vsel %vm647_vm12, %v618_v43, %v620_v34 }
 0x173   : > { %691 = vmatpush.bf16.msra.mxu0 %v648_v44 }
 0x176   : > { %899 = vmatmul.msk.bf16.vlgmr.msra.gmra.mxu0 %vm668_vm13, %v606_v36 }
 0x1db   : > { %v706_v45 = vpop.f32.mrf.mxu1 }
 0x1dc   : > { %v751_v14 = vmul.f32 %v743_v49, %v706_v45  ;;  %737 = vst [vmem:[%s1009_s17 + $0x8] sm:$0xff] %v706_v45 }
 0x1de   : > { %v761_v57 = vmul.f32 %v751_v14, %v706_v45 }
 0x1e3   : > { %v708_v46 = vpop.f32.mrf.mxu1 }
 0x1e8   : > { %v719_v47 = vpop.f32.mrf.mxu2 }
 0x1e9   : > { %v752_v55 = vmul.f32 %v744_v50, %v719_v47  ;;  %738 = vst [vmem:[%s1009_s17 + $0x10] sm:$0xff] %v719_v47 }
 0x1eb   : > { %v762_v61 = vmul.f32 %v752_v55, %v719_v47 }
 0x1f0   : > { %v732_v51 = vpop.f32.mrf.mxu3  ;;  %v721_v53 = vpop.f32.mrf.mxu2 }
 0x1f1   : > { %v753_v59 = vmul.f32 %v745_v13, %v732_v51  ;;  %739 = vst [vmem:[%s1009_s17 + $0x18] sm:$0xff] %v732_v51 }
 0x1f3   : > { %v693_v54 = vpop.f32.mrf.mxu0  ;;  %v763_v12 = vmul.f32 %v753_v59, %v732_v51 }
 0x1f4   : > { %736 = vst [vmem:[%s1009_s17] sm:$0xff] %v693_v54  ;;  %v750_v56 = vmul.f32 %v742_v52, %v693_v54 }
 0x1f6   : > { %v760_v58 = vmul.f32 %v750_v56, %v693_v54  ;;  %v755_v60 = vadd.f32 %v751_v14, %v750_v56 }
 0x1f8   : > { %v734_v62 = vpop.f32.mrf.mxu3  ;;  %v756_v63 = vadd.f32 %v755_v60, %v752_v55  ;;  %v764_v0 = vadd.f32 %v761_v57, %v760_v58 }
 0x1fa   : > { %v757_v1 = vadd.f32 %v756_v63, %v753_v59  ;;  %v765_v2 = vadd.f32 %v764_v0, %v762_v61 }
 0x1fb   : > { %v695_v3 = vpop.f32.mrf.mxu0 }
 0x1fc   : > { %758 = vadd.xlane.f32.xlu0 %v757_v1  ;;  %v766_v4 = vadd.f32 %v765_v2, %v763_v12 }
 0x1fe   : > { %767 = vadd.xlane.f32.xlu1 %v766_v4 }
 0x26f   : > { %v759_v6 = vpop.xlane.xlu0 %758 }
 0x271   : > { %v768_v7 = vpop.xlane.xlu1 %767 }
 0x272   : > { %v770_v8 = vsel %vm769_vm14, %v759_v6, %v768_v7 }
 0x273   : > { %v771_v9 = vadd.f32 %v770_v8, %v754_v5 }
 0x275   : > { %773 = vst.msk [vmem:[%s1211_s6] sm:$0xff] %vm772_vm15, %v771_v9 }
 0x276 PF: > { %s17_s21 = sadd.s32 1, %s935_s21  }
 0x277   : > { %p14_p8 = scmp.ge.s32.totalorder %s17_s21, 4  }
 0x279   :  { %16 = sbr.rel (!%p14_p8) target bundleno = 1 (0x1), region = 92 }

// kernel: up_res_layer_pallas.10
= control target key start
LH: loop header
LB: loop body
LE: loop exit
PB: predicated region body
PF: predicated region fallthrough
CT: control target
= control target key end

     0   :  { %s763_s13 = smov 0   ;;  %s844_s0 = inlined_call_operand.vmem [shape: f32[8,1024], index: 0, kind: input, shape index: {}]   ;;  %s845_s1 = inlined_call_operand.vmem [shape: f32[8,2], index: 1, kind: input, shape index: {}]   ;;  %s846_s2 = inlined_call_operand.vmem [shape: f32[8,1], index: 2, kind: input, shape index: {}]   ;;  %s847_s3 = inlined_call_operand.vmem [shape: f32[8,1], index: 3, kind: input, shape index: {}]   ;;  %s848_s4 = inlined_call_operand.vmem [shape: f32[8,1024], index: 4, kind: input, shape index: {}]   ;;  %s849_s5 = inlined_call_operand.vmem [shape: f32[8,2], index: 5, kind: input, shape index: {}]   ;;  %s850_s6 = inlined_call_operand.vmem [shape: f32[8,1], index: 6, kind: input, shape index: {}]   ;;  %s851_s7 = inlined_call_operand.vmem [shape: f32[8,1], index: 7, kind: input, shape index: {}]   ;;  %s852_s8 = inlined_call_operand.vmem [shape: f32[1,1024], index: 8, kind: input, shape index: {}]   ;;  %s853_s9 = inlined_call_operand.vmem [shape: f32[8,1024], index: 9, kind: output, shape index: {0}]   ;;  %s854_s10 = inlined_call_operand.vmem [shape: f32[8,2], index: 10, kind: output, shape index: {1}]  }
   0x1 LB: > { %s661_s14 = sadd.s32 4294967295, %s702_s13   ;;  %p665_p0 = scmp.ge.s32.totalorder %s702_s13, 1  ;;  %s702_s13 = sphi %s763_s13, %s21_s13  }
   0x2   : > { %p332_p1 = scmp.lt.s32.totalorder %s702_s13, 3 }
   0x4   : > { %p333_p2 = pnand %p665_p0, %p332_p1 }
   0x5   : > { %s666_s15 = sshll.u32 (!%p333_p2), %s661_s14, 2  ;;  %p673_p4 = scmp.ne.s32.totalorder (!%p333_p2), %s661_s14, 0 }
   0x6   : > { %336 = sbr.rel (%p333_p2) target bundleno = 399 (0x18f), region = 56  ;;  %p380_p3 = scmp.lt.s32.totalorder (!%p333_p2), %s666_s15, 7 }
   0xb   : > { %s856_s15 = smov (!%p380_p3, %s666_s15), 7  ;;  %405 = sbr.rel (%p673_p4) target bundleno = 18 (0x12), region = 60 }
   0xc   : > { %s667_s16 = sshll.u32 %s856_s15, 3  ;;  %s394_s19 = scalar_lea.vmem %s852_s8, %s856_s15 }
   0xd   : > { %s781_s22 = scalar_lea.vmem %s844_s0, %s667_s16  ;;  %s786_s25 = scalar_lea.vmem %s848_s4, %s667_s16 }
   0xe   : > { %s791_s28 = scalar_lea.vmem %s853_s9, %s667_s16 }
  0x10   : > { %vm406_vm0 = vcmask 15360   ;;  %v704_v0 = vmov 0.0  }
  0x11   : > { %407 = vst.msk [vmem:[%s854_s10] sm:$0xff] %vm406_vm0, %v704_v0 }
  0x12 PF: > { %v408_v1 = vld [vmem:[%s845_s1] sm:$0xff]  ;;  %s705_s16 = smov 1   ;;  %v706_v4 = vmov 0   ;;  %v707_v12 = vmov 1   ;;  %v418_v41 = vld [vmem:[%s781_s22 + $0x8] sm:$0xff]  ;;  %v419_v42 = vld [vmem:[%s781_s22 + $0x10] sm:$0xff] }
  0x13   : > { %v441_v2 = vld [vmem:[%s846_s2] sm:$0xff]  ;;  %v409_v3 = vmul.f32 0.001953125, %v408_v1  ;;  %689 = vset.pattern.permute.xlu0 %v706_v4  ;;  %690 = vset.pattern.permute.xlu1 %v706_v4  ;;  %v420_v43 = vld [vmem:[%s781_s22 + $0x18] sm:$0xff]  ;;  %v488_v55 = vld [vmem:[%s786_s25 + $0x8] sm:$0xff]  ;;  %vm573_vm11 = vcmask 7168   ;;  %vm576_vm12 = vcmask 15360  }
  0x14   : > { %443 = vrot.lane.b32.xlu1 %v441_v2, %s705_s16  ;;  %v478_v5 = vld [vmem:[%s849_s5] sm:$0xff]  ;;  %688 = vset.pattern.permute.xlu2 %v706_v4  ;;  %v489_v56 = vld [vmem:[%s786_s25 + $0x10] sm:$0xff]  ;;  %v490_v57 = vld [vmem:[%s786_s25 + $0x18] sm:$0xff] }
  0x15   : > { %v410_v6 = vmul.f32 %v409_v3, %v409_v3  ;;  %423 = vperm.xlu2 %688, %v409_v3   ;;  %v479_v7 = vmul.f32 0.001953125, %v478_v5  ;;  %v511_v8 = vld [vmem:[%s850_s6] sm:$0xff] }
  0x16   : > { %v456_v10 = vld [vmem:[%s847_s3] sm:$0xff] }
  0x17   : > { %412 = vrot.lane.b32.xlu0 %v410_v6, %s705_s16  ;;  %v480_v9 = vmul.f32 %v479_v7, %v479_v7  ;;  %v526_v11 = vld [vmem:[%s851_s7] sm:$0xff] }
  0x18   : > { %v417_v40 = vld [vmem:[%s781_s22] sm:$0xff] }
  0x19   : > { %v487_v54 = vld [vmem:[%s786_s25] sm:$0xff] }
  0x1c   : > { %513 = vrot.lane.b32.xlu1 %v511_v8, %s705_s16 }
  0x1d   : > { %691 = vset.pattern.permute.xlu2 %v707_v12 }
  0x1f   : > { %482 = vrot.lane.b32.xlu0 %v480_v9, %s705_s16 }
  0x24   : > { %459 = vperm.xlu1 %690, %v456_v10  }
  0x27   : > { %493 = vperm.xlu0 %689, %v479_v7  }
  0x2c   : > { %529 = vperm.xlu1 %690, %v526_v11  }
  0x6f   : > { %v424_v39 = vpop.permute.xlu2 %423 }
  0x70   : > { %v426_v44 = vsub.f32 %v417_v40, %v424_v39  ;;  %v427_v45 = vsub.f32 %v418_v41, %v424_v39  ;;  %v428_v46 = vsub.f32 %v419_v42, %v424_v39  ;;  %v429_v47 = vsub.f32 %v420_v43, %v424_v39 }
  0x86   : > { %v444_v25 = vpop.permute.xlu1 %443 }
  0x89   : > { %v413_v13 = vpop.permute.xlu0 %412 }
  0x8a   : > { %v415_v14 = vsub.f32 %v409_v3, %v413_v13  ;;  %v544_v3 = vld [vmem:[%s394_s19] sm:$0xf] }
  0x8c   : > { %v416_v15 = vmax.f32 %v415_v14, 0.0  ;;  %v546_v14 = vperm.slane %v544_v3, 0 }
  0x8e   : > { %v430_v16 = vadd.f32 1e-05, %v416_v15  ;;  %v514_v35 = vpop.permute.xlu1 %513  ;;  %v547_v15 = vperm.slane %v544_v3, 1 }
  0x90   : > { %692 = vrsqrt.f32 %v430_v16  ;;  %vm437_vm2 = vweird.f32 %v430_v16 }
  0x91   : > { %v483_v17 = vpop.permute.xlu0 %482 }
  0x92   : > { %v485_v18 = vsub.f32 %v479_v7, %v483_v17  ;;  %v549_v17 = vperm.slane %v544_v3, 3 }
  0x94   : > { %v486_v19 = vmax.f32 %v485_v18, 0.0 }
  0x96   : > { %v693_v20 = vpop.eup %692  ;;  %v500_v21 = vadd.f32 1e-05, %v486_v19  ;;  %v460_v48 = vpop.permute.xlu1 %459 }
  0x97   : > { %v432_v22 = vmul.f32 %v693_v20, %v430_v16  ;;  %vm438_vm1 = vweird.f32 %v693_v20  ;;  %v548_v16 = vperm.slane %v544_v3, 2 }
  0x98   : > { %694 = vrsqrt.f32 %v500_v21  ;;  %vm439_vm3 = vmor %vm437_vm2, %vm438_vm1  ;;  %vm507_vm5 = vweird.f32 %v500_v21 }
  0x99   : > { %v433_v23 = vmul.f32 %v693_v20, %v432_v22  ;;  %v494_v58 = vpop.permute.xlu0 %493 }
  0x9a   : > { %v496_v63 = vsub.f32 %v487_v54, %v494_v58  ;;  %v497_v0 = vsub.f32 %v488_v55, %v494_v58  ;;  %v498_v1 = vsub.f32 %v489_v56, %v494_v58  ;;  %v499_v2 = vsub.f32 %v490_v57, %v494_v58 }
  0x9b   : > { %v434_v24 = vmul.f32 0.5, %v433_v23 }
  0x9d   : > { %v435_v26 = vsub.f32 1.5, %v434_v24 }
  0x9e   : > { %v695_v27 = vpop.eup %694  ;;  %v530_v13 = vpop.permute.xlu1 %529 }
  0x9f   : > { %v502_v28 = vmul.f32 %v695_v27, %v500_v21  ;;  %v436_v29 = vmul.f32 %v693_v20, %v435_v26  ;;  %vm508_vm4 = vweird.f32 %v695_v27 }
  0xa0   : > { %vm509_vm6 = vmor %vm507_vm5, %vm508_vm4 }
  0xa1   : > { %v503_v30 = vmul.f32 %v695_v27, %v502_v28  ;;  %v440_v31 = vsel %vm439_vm3, %v693_v20, %v436_v29 }
  0xa2   : > { %v446_v32 = vmul.f32 %v444_v25, %v440_v31 }
  0xa3   : > { %v504_v33 = vmul.f32 0.5, %v503_v30 }
  0xa4   : > { %449 = vperm.xlu2 %691, %v446_v32  }
  0xa5   : > { %v505_v34 = vsub.f32 1.5, %v504_v33 }
  0xa7   : > { %v506_v36 = vmul.f32 %v695_v27, %v505_v34 }
  0xa9   : > { %v510_v37 = vsel %vm509_vm6, %v695_v27, %v506_v36 }
  0xaa   : > { %v516_v38 = vmul.f32 %v514_v35, %v510_v37 }
  0xac   : > { %519 = vperm.xlu2 %691, %v516_v38  }
  0xfe   : > { %v450_v49 = vpop.permute.xlu2 %449 }
  0xff   : > { %v452_v50 = vmul.f32 %v450_v49, %v426_v44  ;;  %v453_v51 = vmul.f32 %v450_v49, %v427_v45  ;;  %v454_v52 = vmul.f32 %v450_v49, %v428_v46  ;;  %v455_v53 = vmul.f32 %v450_v49, %v429_v47  ;;  %v558_v44 = vld [vmem:[%s854_s10] sm:$0xff] }
 0x101   : > { %v462_v59 = vadd.f32 %v460_v48, %v452_v50  ;;  %v463_v60 = vadd.f32 %v460_v48, %v453_v51  ;;  %v464_v61 = vadd.f32 %v460_v48, %v454_v52  ;;  %v465_v62 = vadd.f32 %v460_v48, %v455_v53 }
 0x103   : > { %vm466_vm7 = vcmp.ge.f32.partialorder %v462_v59, 0.0  ;;  %vm467_vm8 = vcmp.ge.f32.partialorder %v463_v60, 0.0  ;;  %v470_v4 = vmul.f32 0.2, %v462_v59  ;;  %v471_v5 = vmul.f32 0.2, %v463_v60 }
 0x104   : > { %vm468_vm9 = vcmp.ge.f32.partialorder %v464_v61, 0.0  ;;  %v472_v6 = vmul.f32 0.2, %v464_v61  ;;  %v473_v7 = vmul.f32 0.2, %v465_v62  ;;  %vm469_vm10 = vcmp.ge.f32.partialorder %v465_v62, 0.0 }
 0x105   : > { %v474_v22 = vsel %vm466_vm7, %v462_v59, %v470_v4  ;;  %v475_v23 = vsel %vm467_vm8, %v463_v60, %v471_v5 }
 0x106   : > { %v520_v8 = vpop.permute.xlu2 %519  ;;  %v476_v24 = vsel %vm468_vm9, %v464_v61, %v472_v6  ;;  %v477_v25 = vsel %vm469_vm10, %v465_v62, %v473_v7 }
 0x107   : > { %v522_v9 = vmul.f32 %v520_v8, %v496_v63  ;;  %v523_v10 = vmul.f32 %v520_v8, %v497_v0  ;;  %v524_v11 = vmul.f32 %v520_v8, %v498_v1  ;;  %v525_v12 = vmul.f32 %v520_v8, %v499_v2 }
 0x109   : > { %v532_v18 = vadd.f32 %v530_v13, %v522_v9  ;;  %v533_v19 = vadd.f32 %v530_v13, %v523_v10  ;;  %v534_v20 = vadd.f32 %v530_v13, %v524_v11  ;;  %v535_v21 = vadd.f32 %v530_v13, %v525_v12 }
 0x10b   : > { %v536_v26 = vadd.f32 %v532_v18, %v474_v22  ;;  %v537_v27 = vadd.f32 %v533_v19, %v475_v23  ;;  %v538_v28 = vadd.f32 %v534_v20, %v476_v24  ;;  %v539_v29 = vadd.f32 %v535_v21, %v477_v25 }
 0x10d   : > { %540 = vst [vmem:[%s791_s28] sm:$0xff] %v536_v26  ;;  %v554_v30 = vmul.f32 %v546_v14, %v536_v26  ;;  %v555_v31 = vmul.f32 %v547_v15, %v537_v27  ;;  %v556_v32 = vmul.f32 %v548_v16, %v538_v28  ;;  %v557_v33 = vmul.f32 %v549_v17, %v539_v29 }
 0x10e   : > { %541 = vst [vmem:[%s791_s28 + $0x8] sm:$0xff] %v537_v27 }
 0x10f   : > { %542 = vst [vmem:[%s791_s28 + $0x10] sm:$0xff] %v538_v28  ;;  %v559_v34 = vadd.f32 %v555_v31, %v554_v30  ;;  %v564_v35 = vmul.f32 %v554_v30, %v536_v26  ;;  %v565_v36 = vmul.f32 %v555_v31, %v537_v27  ;;  %v566_v38 = vmul.f32 %v556_v32, %v538_v28 }
 0x110   : > { %543 = vst [vmem:[%s791_s28 + $0x18] sm:$0xff] %v539_v29  ;;  %v567_v41 = vmul.f32 %v557_v33, %v539_v29 }
 0x111   : > { %v560_v37 = vadd.f32 %v559_v34, %v556_v32  ;;  %v568_v39 = vadd.f32 %v565_v36, %v564_v35 }
 0x113   : > { %v561_v40 = vadd.f32 %v560_v37, %v557_v33  ;;  %v569_v42 = vadd.f32 %v568_v39, %v566_v38 }
 0x115   : > { %562 = vadd.xlane.f32.xlu2 %v561_v40  ;;  %v570_v43 = vadd.f32 %v569_v42, %v567_v41 }
 0x117   : > { %571 = vadd.xlane.f32.xlu0 %v570_v43 }
 0x188   : > { %v563_v45 = vpop.xlane.xlu2 %562 }
 0x18a   : > { %v572_v46 = vpop.xlane.xlu0 %571 }
 0x18b   : > { %v574_v47 = vsel %vm573_vm11, %v563_v45, %v572_v46 }
 0x18c   : > { %v575_v48 = vadd.f32 %v574_v47, %v558_v44 }
 0x18e   : > { %577 = vst.msk [vmem:[%s854_s10] sm:$0xff] %vm576_vm12, %v575_v48 }
 0x18f PF: > { %s21_s13 = sadd.s32 1, %s702_s13  }
 0x190   : > { %p18_p5 = scmp.ge.s32.totalorder %s21_s13, 4  }
 0x192   :  { %20 = sbr.rel (!%p18_p5) target bundleno = 1 (0x1), region = 104 }

</bundles_post_ra>
